<compile_context>
chip_gen: v5e
topology: v5e:2x2
jax: 0.10.0
libtpu: 0.0.40
codegen_flags: <defaults>
</compile_context>

<pallas_src>
import jax
import jax.numpy as jnp
from jax import lax
from jax.experimental import pallas as pl
from jax.experimental.pallas import tpu as pltpu


def _round_up(n, m):
    return ((n + m - 1) // m) * m


# ----------------------------------------------------------------------------
# Fused Pallas kernel: 4 x (bf16 matmul w/ f32 accumulation + f32 bias + tanh).
# ----------------------------------------------------------------------------
def _lenet1989_fused_kernel(x_ref, w1_ref, b1_ref, w2_ref, b2_ref,
                            w3_ref, b3_ref, w4_ref, b4_ref, o_ref):
    f32 = jnp.float32
    bf16 = jnp.bfloat16
    # H1: 5x5/s2 conv (pre-lowered to a dense matmul) + per-position bias.
    h1 = jnp.tanh(jnp.dot(x_ref[...], w1_ref[...], preferred_element_type=f32)
                  + b1_ref[...])
    # H2: 3-way partially-connected conv as ONE masked-dense matmul; the
    # (-1)-padding contribution is already folded into b2.
    h2 = jnp.tanh(jnp.dot(h1.astype(bf16), w2_ref[...],
                          preferred_element_type=f32) + b2_ref[...])
    # H3 fully connected (rows permuted wrapper-side to match NCHW flatten).
    h3 = jnp.tanh(jnp.dot(h2.astype(bf16), w3_ref[...],
                          preferred_element_type=f32) + b3_ref[...])
    # Output FC, zero-padded to 128 lanes for an unmasked lane-dense store.
    o_ref[...] = jnp.tanh(jnp.dot(h3.astype(bf16), w4_ref[...],
                                  preferred_element_type=f32) + b4_ref[...])


def _fused_forward(x_flat, w1, b1, w2, b2, w3, b3, w4, b4, *, tm):
    Bp, K = x_flat.shape
    n_out = w4.shape[1]
    grid = (Bp // tm,)

    def resident(arr):
        # Full-array block, same block index every grid step -> loaded once,
        # stays VMEM-resident for the whole kernel.
        return pl.BlockSpec(arr.shape, lambda i: (0, 0))

    return pl.pallas_call(
        _lenet1989_fused_kernel,
        out_shape=jax.ShapeDtypeStruct((Bp, n_out), jnp.float32),
        grid=grid,
        in_specs=[pl.BlockSpec((tm, K), lambda i: (i, 0))]
                 + [resident(a) for a in (w1, b1, w2, b2, w3, b3, w4, b4)],
        out_specs=pl.BlockSpec((tm, n_out), lambda i: (i, 0)),
        compiler_params=pltpu.CompilerParams(
            dimension_semantics=("parallel",),
            vmem_limit_bytes=32 * 1024 * 1024),
    )(x_flat, w1, b1, w2, b2, w3, b3, w4, b4)


# ----------------------------------------------------------------------------
# Wrapper-side parameter preprocessing (vectorized, no Python im2col loops).
# ----------------------------------------------------------------------------
def _conv_to_dense(w, h_in, w_in, stride):
    """Lower a VALID 2-D conv to a dense matrix.

    w: (Cout, Cin, kh, kw).  Returns M of shape
    (h_in*w_in*Cin, h_out*w_out*Cout) such that
    NHWC-flattened-input @ M == NHWC-flattened VALID-conv output.
    """
    cout, cin, kh, kw = w.shape
    h_out = (h_in - kh) // stride + 1
    w_out = (w_in - kw) // stride + 1
    pi = jnp.arange(h_in).reshape(h_in, 1, 1, 1, 1, 1)
    pj = jnp.arange(w_in).reshape(1, w_in, 1, 1, 1, 1)
    ci = jnp.arange(cin).reshape(1, 1, cin, 1, 1, 1)
    oi = jnp.arange(h_out).reshape(1, 1, 1, h_out, 1, 1)
    oj = jnp.arange(w_out).reshape(1, 1, 1, 1, w_out, 1)
    co = jnp.arange(cout).reshape(1, 1, 1, 1, 1, cout)
    di = pi - stride * oi
    dj = pj - stride * oj
    valid = (di >= 0) & (di < kh) & (dj >= 0) & (dj < kw)
    vals = w[co, ci, jnp.clip(di, 0, kh - 1), jnp.clip(dj, 0, kw - 1)]
    mat = jnp.where(valid, vals, jnp.float32(0))
    return mat.reshape(h_in * w_in * cin, h_out * w_out * cout)


def _build_kernel_operands(params):
    """PyTorch-layout params -> lane-padded bf16 weights + f32 biases."""
    f32 = jnp.float32
    bf16 = jnp.bfloat16

    # --- H1: 5x5 stride-2 conv on the (-1)-padded 20x20x1 input -> (8,8,12) --
    w1u = _conv_to_dense(params["H1w"], 20, 20, 2)                     # (400, 768)
    b1 = jnp.transpose(params["H1b"], (1, 2, 0)).reshape(1, 768)       # NHWC flat

    # --- H2: three partially-connected convs == one dense conv whose weight is
    #     zero on the unconnected input planes. -------------------------------
    H2w = params["H2w"]
    z = jnp.zeros((4, 4, 5, 5), f32)
    w2_dense = jnp.concatenate([
        jnp.concatenate([H2w[0:4], z], axis=1),                        # planes 0:8
        jnp.concatenate([z, H2w[4:8]], axis=1),                        # planes 4:12
        jnp.concatenate([H2w[8:12, 0:4], z, H2w[8:12, 4:8]], axis=1),  # 0:4 + 8:12
    ], axis=0)                                                         # (12,12,5,5)
    # Dense matrix over the (-1)-padded 12x12x12 grid; split into the interior
    # contribution (a matmul on h1) and the constant border term (pad = -1).
    w2u_pad = _conv_to_dense(w2_dense, 12, 12, 2)                      # (1728, 192)
    w2u = w2u_pad.reshape(12, 12, 12, 192)[2:10, 2:10].reshape(768, 192)
    border = -(jnp.sum(w2u_pad, axis=0) - jnp.sum(w2u, axis=0))
    b2 = (border
          + jnp.transpose(params["H2b"], (1, 2, 0)).reshape(192)).reshape(1, 192)

    # --- H3: permute rows so the kernel's NHWC-flattened h2 matches PyTorch's
    #     NCHW flatten order. -------------------------------------------------
    oi = jnp.arange(4)
    oj = jnp.arange(4)
    co = jnp.arange(12)
    perm = (co[None, None, :] * 16 + oi[:, None, None] * 4
            + oj[None, :, None]).reshape(192)
    w3 = params["H3w"][perm, :]                                        # (192, 30)

    # --- Lane-pad everything to multiples of 128 (zero pad => exact no-op) and
    #     cast matmul operands to bf16 for the MXU; keep biases f32. ----------
    w1u = jnp.pad(w1u, ((0, 512 - 400), (0, 0))).astype(bf16)          # (512, 768)
    w2u = jnp.pad(w2u, ((0, 0), (0, 256 - 192))).astype(bf16)          # (768, 256)
    b2 = jnp.pad(b2, ((0, 0), (0, 256 - 192)))                         # (1, 256)
    w3 = jnp.pad(w3, ((0, 256 - 192), (0, 128 - 30))).astype(bf16)     # (256, 128)
    b3 = jnp.pad(params["H3b"].reshape(1, 30), ((0, 0), (0, 128 - 30)))
    w4 = jnp.zeros((128, 128), f32).at[:30, :10].set(params["outw"]).astype(bf16)
    b4 = jnp.zeros((1, 128), f32).at[:, :10].set(params["outb"])
    return w1u, b1, w2u, b2, w3, b3, w4, b4


def net_forward(x_nchw, params):
    B = x_nchw.shape[0]
    # Pad the 16x16 single-channel input with -1 (as in the PyTorch module) and
    # flatten; with one input channel the NHWC flat order is plain row-major.
    xp = jnp.pad(x_nchw.reshape(B, 16, 16), ((0, 0), (2, 2), (2, 2)),
                 constant_values=-1.0).reshape(B, 400)
    # Lane-pad 400 -> 512 (matching zero rows were added to w1u).
    xp = jnp.pad(xp, ((0, 0), (0, 512 - 400)))
    # Batch tile: multiple of 8 sublanes, capped at 1024 rows (fits v7x VMEM).
    tm = min(1024, _round_up(B, 8))
    Bp = _round_up(B, tm)
    xp = jnp.pad(xp, ((0, Bp - B), (0, 0))).astype(jnp.bfloat16)
    operands = _build_kernel_operands(params)
    out_padded = _fused_forward(xp, *operands, tm=tm)                  # (Bp, 128)
    return out_padded[:B, :10]


# ----------------------------------------------------------------------------
# Pure-JAX f32 reference that mirrors the PyTorch module op-for-op.
# ----------------------------------------------------------------------------
def net_forward_ref(x_nchw, params):
    dn = ("NCHW", "OIHW", "NCHW")
    hp = lax.Precision.HIGHEST
    xp = jnp.pad(x_nchw, ((0, 0), (0, 0), (2, 2), (2, 2)), constant_values=-1.0)
    h1 = jnp.tanh(lax.conv_general_dilated(xp, params["H1w"], (2, 2), "VALID",
                                           dimension_numbers=dn, precision=hp)
                  + params["H1b"][None])
    h1p = jnp.pad(h1, ((0, 0), (0, 0), (2, 2), (2, 2)), constant_values=-1.0)
    s1 = lax.conv_general_dilated(h1p[:, 0:8], params["H2w"][0:4], (2, 2),
                                  "VALID", dimension_numbers=dn, precision=hp)
    s2 = lax.conv_general_dilated(h1p[:, 4:12], params["H2w"][4:8], (2, 2),
                                  "VALID", dimension_numbers=dn, precision=hp)
    s3 = lax.conv_general_dilated(
        jnp.concatenate([h1p[:, 0:4], h1p[:, 8:12]], axis=1), params["H2w"][8:12],
        (2, 2), "VALID", dimension_numbers=dn, precision=hp)
    h2 = jnp.tanh(jnp.concatenate([s1, s2, s3], axis=1) + params["H2b"][None])
    h2f = h2.reshape(h2.shape[0], -1)                                  # NCHW flatten
    h3 = jnp.tanh(jnp.dot(h2f, params["H3w"], precision=hp) + params["H3b"][None, :])
    return jnp.tanh(jnp.dot(h3, params["outw"], precision=hp)
                    + params["outb"][None, :])


# ----------------------------------------------------------------------------
# Deterministic parameter init (mirrors the PyTorch __init__ shapes).
# ----------------------------------------------------------------------------
def init_params(key):
    def winit(k, fan_in, shape):
        return (jax.random.uniform(k, shape, jnp.float32) - 0.5) * 2 * 2.4 / fan_in ** 0.5

    k1, k2, k3, k4 = jax.random.split(key, 4)
    return {
        "H1w": winit(k1, 5 * 5 * 1, (12, 1, 5, 5)),
        "H1b": jnp.zeros((12, 8, 8), jnp.float32),
        "H2w": winit(k2, 5 * 5 * 8, (12, 8, 5, 5)),
        "H2b": jnp.zeros((12, 4, 4), jnp.float32),
        "H3w": winit(k3, 4 * 4 * 12, (4 * 4 * 12, 30)),
        "H3b": jnp.zeros((30,), jnp.float32),
        "outw": winit(k4, 30, (30, 10)),
        "outb": -jnp.ones((10,), jnp.float32),
    }


if __name__ == "__main__":
    key = jax.random.PRNGKey(0)
    pkey, xkey = jax.random.split(key)
    params = init_params(pkey)
    # NCHW input, like the PyTorch module expects: (batch=2, 1, 16, 16).
    x = jax.random.normal(xkey, (2, 1, 16, 16), jnp.float32)

    fwd = jax.jit(net_forward)
    ref_fn = jax.jit(net_forward_ref)

    out = jax.block_until_ready(fwd(x, params))
    ref = jax.block_until_ready(ref_fn(x, params))

    assert out.shape == (2, 10), out.shape
    # bf16 MXU operands (f32 accumulation) vs. the all-f32 reference: a ~1e-2
    # tolerance is the expected bf16 noise level for this 4-layer net.
    assert jnp.allclose(out, ref, atol=3e-2, rtol=3e-2), "Pallas output mismatch"
    print("KERNEL_OK")
</pallas_src>

<mosaic_0001>
module attributes {stable_mosaic.version = 11 : i64} {
  func.func @_lenet1989_fused_kernel(%arg0: i32, %arg1: memref<8x512xbf16, #tpu.memory_space<vmem>>, %arg2: memref<512x768xbf16, #tpu.memory_space<vmem>>, %arg3: memref<1x768xf32, #tpu.memory_space<vmem>>, %arg4: memref<768x256xbf16, #tpu.memory_space<vmem>>, %arg5: memref<1x256xf32, #tpu.memory_space<vmem>>, %arg6: memref<256x128xbf16, #tpu.memory_space<vmem>>, %arg7: memref<1x128xf32, #tpu.memory_space<vmem>>, %arg8: memref<128x128xbf16, #tpu.memory_space<vmem>>, %arg9: memref<1x128xf32, #tpu.memory_space<vmem>>, %arg10: memref<8x128xf32, #tpu.memory_space<vmem>>) attributes {dimension_semantics = [#tpu.dimension_semantics<parallel>], iteration_bounds = array<i64: 1>, scalar_prefetch = 0 : i64, scratch_operands = 0 : i64, tpu.core_type = #tpu.core_type<tc>, window_params = [{transform_indices = @transform_0, window_bounds = array<i64: 8, 512>}, {pipeline_mode = #tpu.pipeline_mode<synchronous>, transform_indices = @transform_1, window_bounds = array<i64: 512, 768>}, {pipeline_mode = #tpu.pipeline_mode<synchronous>, transform_indices = @transform_2, window_bounds = array<i64: 1, 768>}, {pipeline_mode = #tpu.pipeline_mode<synchronous>, transform_indices = @transform_3, window_bounds = array<i64: 768, 256>}, {pipeline_mode = #tpu.pipeline_mode<synchronous>, transform_indices = @transform_4, window_bounds = array<i64: 1, 256>}, {pipeline_mode = #tpu.pipeline_mode<synchronous>, transform_indices = @transform_5, window_bounds = array<i64: 256, 128>}, {pipeline_mode = #tpu.pipeline_mode<synchronous>, transform_indices = @transform_6, window_bounds = array<i64: 1, 128>}, {pipeline_mode = #tpu.pipeline_mode<synchronous>, transform_indices = @transform_7, window_bounds = array<i64: 128, 128>}, {pipeline_mode = #tpu.pipeline_mode<synchronous>, transform_indices = @transform_8, window_bounds = array<i64: 1, 128>}, {transform_indices = @transform_9, window_bounds = array<i64: 8, 128>}]} {
    %c0 = arith.constant 0 : index
    %c0_0 = arith.constant 0 : index
    %0 = vector.load %arg1[%c0, %c0_0] : memref<8x512xbf16, #tpu.memory_space<vmem>>, vector<8x512xbf16>
    %c0_1 = arith.constant 0 : index
    %c0_2 = arith.constant 0 : index
    %1 = vector.load %arg2[%c0_1, %c0_2] : memref<512x768xbf16, #tpu.memory_space<vmem>>, vector<512x768xbf16>
    %cst = arith.constant dense<0.000000e+00> : vector<8x768xf32>
    %2 = tpu.matmul %0, %1, %cst {dimension_numbers = #tpu.dot_dimension_numbers<[1], [0], [0], [1], [0, 0, 1, 1], [], []>} : vector<8x512xbf16>, vector<512x768xbf16>, vector<8x768xf32> -> vector<8x768xf32>
    %c0_3 = arith.constant 0 : index
    %c0_4 = arith.constant 0 : index
    %3 = vector.load %arg3[%c0_3, %c0_4] : memref<1x768xf32, #tpu.memory_space<vmem>>, vector<1x768xf32>
    %4 = vector.broadcast %3 : vector<1x768xf32> to vector<8x768xf32>
    %5 = arith.addf %2, %4 : vector<8x768xf32>
    %6 = math.tanh %5 : vector<8x768xf32>
    %7 = arith.truncf %6 : vector<8x768xf32> to vector<8x768xbf16>
    %c0_5 = arith.constant 0 : index
    %c0_6 = arith.constant 0 : index
    %8 = vector.load %arg4[%c0_5, %c0_6] : memref<768x256xbf16, #tpu.memory_space<vmem>>, vector<768x256xbf16>
    %cst_7 = arith.constant dense<0.000000e+00> : vector<8x256xf32>
    %9 = tpu.matmul %7, %8, %cst_7 {dimension_numbers = #tpu.dot_dimension_numbers<[1], [0], [0], [1], [0, 0, 1, 1], [], []>} : vector<8x768xbf16>, vector<768x256xbf16>, vector<8x256xf32> -> vector<8x256xf32>
    %c0_8 = arith.constant 0 : index
    %c0_9 = arith.constant 0 : index
    %10 = vector.load %arg5[%c0_8, %c0_9] : memref<1x256xf32, #tpu.memory_space<vmem>>, vector<1x256xf32>
    %11 = vector.broadcast %10 : vector<1x256xf32> to vector<8x256xf32>
    %12 = arith.addf %9, %11 : vector<8x256xf32>
    %13 = math.tanh %12 : vector<8x256xf32>
    %14 = arith.truncf %13 : vector<8x256xf32> to vector<8x256xbf16>
    %c0_10 = arith.constant 0 : index
    %c0_11 = arith.constant 0 : index
    %15 = vector.load %arg6[%c0_10, %c0_11] : memref<256x128xbf16, #tpu.memory_space<vmem>>, vector<256x128xbf16>
    %cst_12 = arith.constant dense<0.000000e+00> : vector<8x128xf32>
    %16 = tpu.matmul %14, %15, %cst_12 {dimension_numbers = #tpu.dot_dimension_numbers<[1], [0], [0], [1], [0, 0, 1, 1], [], []>} : vector<8x256xbf16>, vector<256x128xbf16>, vector<8x128xf32> -> vector<8x128xf32>
    %c0_13 = arith.constant 0 : index
    %c0_14 = arith.constant 0 : index
    %17 = vector.load %arg7[%c0_13, %c0_14] : memref<1x128xf32, #tpu.memory_space<vmem>>, vector<1x128xf32>
    %18 = vector.broadcast %17 : vector<1x128xf32> to vector<8x128xf32>
    %19 = arith.addf %16, %18 : vector<8x128xf32>
    %20 = math.tanh %19 : vector<8x128xf32>
    %21 = arith.truncf %20 : vector<8x128xf32> to vector<8x128xbf16>
    %c0_15 = arith.constant 0 : index
    %c0_16 = arith.constant 0 : index
    %22 = vector.load %arg8[%c0_15, %c0_16] : memref<128x128xbf16, #tpu.memory_space<vmem>>, vector<128x128xbf16>
    %cst_17 = arith.constant dense<0.000000e+00> : vector<8x128xf32>
    %23 = tpu.matmul %21, %22, %cst_17 {dimension_numbers = #tpu.dot_dimension_numbers<[1], [0], [0], [1], [0, 0, 1, 1], [], []>} : vector<8x128xbf16>, vector<128x128xbf16>, vector<8x128xf32> -> vector<8x128xf32>
    %c0_18 = arith.constant 0 : index
    %c0_19 = arith.constant 0 : index
    %24 = vector.load %arg9[%c0_18, %c0_19] : memref<1x128xf32, #tpu.memory_space<vmem>>, vector<1x128xf32>
    %25 = vector.broadcast %24 : vector<1x128xf32> to vector<8x128xf32>
    %26 = arith.addf %23, %25 : vector<8x128xf32>
    %27 = math.tanh %26 : vector<8x128xf32>
    %c0_20 = arith.constant 0 : index
    %c0_21 = arith.constant 0 : index
    %28 = vector.load %arg10[%c0_20, %c0_21] : memref<8x128xf32, #tpu.memory_space<vmem>>, vector<8x128xf32>
    tpu.vector_store %arg10[%c0_20, %c0_21], %27 {strides = array<i32>} : memref<8x128xf32, #tpu.memory_space<vmem>>, vector<8x128xf32>,
    return
  }
  func.func @transform_0(%arg0: i32) -> (i32, i32) {
    %c0_i32 = arith.constant 0 : i32
    %c0_i32_0 = arith.constant 0 : i32
    return %arg0, %c0_i32 : i32, i32
  }
  func.func @transform_1(%arg0: i32) -> (i32, i32) {
    %c0_i32 = arith.constant 0 : i32
    %c0_i32_0 = arith.constant 0 : i32
    %c0_i32_1 = arith.constant 0 : i32
    return %c0_i32, %c0_i32_0 : i32, i32
  }
  func.func @transform_2(%arg0: i32) -> (i32, i32) {
    %c0_i32 = arith.constant 0 : i32
    %c0_i32_0 = arith.constant 0 : i32
    %c0_i32_1 = arith.constant 0 : i32
    return %c0_i32, %c0_i32_0 : i32, i32
  }
  func.func @transform_3(%arg0: i32) -> (i32, i32) {
    %c0_i32 = arith.constant 0 : i32
    %c0_i32_0 = arith.constant 0 : i32
    %c0_i32_1 = arith.constant 0 : i32
    return %c0_i32, %c0_i32_0 : i32, i32
  }
  func.func @transform_4(%arg0: i32) -> (i32, i32) {
    %c0_i32 = arith.constant 0 : i32
    %c0_i32_0 = arith.constant 0 : i32
    %c0_i32_1 = arith.constant 0 : i32
    return %c0_i32, %c0_i32_0 : i32, i32
  }
  func.func @transform_5(%arg0: i32) -> (i32, i32) {
    %c0_i32 = arith.constant 0 : i32
    %c0_i32_0 = arith.constant 0 : i32
    %c0_i32_1 = arith.constant 0 : i32
    return %c0_i32, %c0_i32_0 : i32, i32
  }
  func.func @transform_6(%arg0: i32) -> (i32, i32) {
    %c0_i32 = arith.constant 0 : i32
    %c0_i32_0 = arith.constant 0 : i32
    %c0_i32_1 = arith.constant 0 : i32
    return %c0_i32, %c0_i32_0 : i32, i32
  }
  func.func @transform_7(%arg0: i32) -> (i32, i32) {
    %c0_i32 = arith.constant 0 : i32
    %c0_i32_0 = arith.constant 0 : i32
    %c0_i32_1 = arith.constant 0 : i32
    return %c0_i32, %c0_i32_0 : i32, i32
  }
  func.func @transform_8(%arg0: i32) -> (i32, i32) {
    %c0_i32 = arith.constant 0 : i32
    %c0_i32_0 = arith.constant 0 : i32
    %c0_i32_1 = arith.constant 0 : i32
    return %c0_i32, %c0_i32_0 : i32, i32
  }
  func.func @transform_9(%arg0: i32) -> (i32, i32) {
    %c0_i32 = arith.constant 0 : i32
    %c0_i32_0 = arith.constant 0 : i32
    return %arg0, %c0_i32 : i32, i32
  }
}

</mosaic_0001>

<bundles_post_ra>
// kernel: net_forward.1
= control target key start
LH: loop header
LB: loop body
LE: loop exit
PB: predicated region body
PF: predicated region fallthrough
CT: control target
= control target key end

     0   :  { %s6052_s1 = inlined_call_operand.vmem [shape: bf16[512,768], index: 1, kind: input, shape index: {}]   ;;  %s6053_s0 = inlined_call_operand.vmem [shape: bf16[8,512], index: 0, kind: input, shape index: {}]   ;;  %s6054_s3 = inlined_call_operand.vmem [shape: bf16[768,256], index: 3, kind: input, shape index: {}]   ;;  %s6055_s2 = inlined_call_operand.vmem [shape: f32[1,768], index: 2, kind: input, shape index: {}]   ;;  %s6056_s4 = inlined_call_operand.vmem [shape: f32[1,256], index: 4, kind: input, shape index: {}]   ;;  %s6057_s6 = inlined_call_operand.vmem [shape: f32[1,128], index: 6, kind: input, shape index: {}]   ;;  %s6058_s5 = inlined_call_operand.vmem [shape: bf16[256,128], index: 5, kind: input, shape index: {}]   ;;  %s6059_s8 = inlined_call_operand.vmem [shape: f32[1,128], index: 8, kind: input, shape index: {}]   ;;  %s6060_s7 = inlined_call_operand.vmem [shape: bf16[128,128], index: 7, kind: input, shape index: {}]   ;;  %s6061_s9 = inlined_call_operand.vmem [shape: f32[8,128], index: 9, kind: output, shape index: {}]  }
   0x1   :  { %v2697_v0 = vld [vmem:[%s6052_s1 + $0x150] sm:$0xf]  ;;  %v3820_v1 = vld [vmem:[%s6052_s1 + $0x164] sm:$0xf0]  ;;  %v2673_v11 = vld [vmem:[%s6052_s1 + $0x120] sm:$0xf] }
   0x2   :  { %v2889_v2 = vld [vmem:[%s6052_s1 + $0x2d0] sm:$0xf]  ;;  %v2698_v3 = vor.u32 %v3820_v1, %v2697_v0  ;;  %v3868_v4 = vld [vmem:[%s6052_s1 + $0x2e4] sm:$0xf0]  ;;  %v3814_v13 = vld [vmem:[%s6052_s1 + $0x134] sm:$0xf0] }
   0x3   :  { %v3081_v5 = vld [vmem:[%s6052_s1 + $0x450] sm:$0xf]  ;;  %v3916_v6 = vld [vmem:[%s6052_s1 + $0x464] sm:$0xf0]  ;;  %v2890_v7 = vor.u32 %v3868_v4, %v2889_v2  ;;  %v2865_v14 = vld [vmem:[%s6052_s1 + $0x2a0] sm:$0xf]  ;;  %v2674_v16 = vor.u32 %v3814_v13, %v2673_v11 }
   0x4   :  { %v3082_v8 = vor.u32 %v3916_v6, %v3081_v5  ;;  %v3273_v9 = vld [vmem:[%s6052_s1 + $0x5d0] sm:$0xf]  ;;  %v3964_v10 = vld [vmem:[%s6052_s1 + $0x5e4] sm:$0xf0]  ;;  %1214 = vmatpush.bf16.msra.mxu0 %v2698_v3  ;;  %v3862_v15 = vld [vmem:[%s6052_s1 + $0x2b4] sm:$0xf0] }
   0x5   :  { %v3274_v12 = vor.u32 %v3964_v10, %v3273_v9  ;;  %1227 = vmatpush.bf16.msra.mxu1 %v2890_v7  ;;  %v2866_v17 = vor.u32 %v3862_v15, %v2865_v14  ;;  %v3057_v18 = vld [vmem:[%s6052_s1 + $0x420] sm:$0xf]  ;;  %v3910_v19 = vld [vmem:[%s6052_s1 + $0x434] sm:$0xf0]  ;;  %v2649_v23 = vld [vmem:[%s6052_s1 + $0xf0] sm:$0xf] }
   0x6   :  { %1240 = vmatpush.bf16.msra.mxu2 %v3082_v8  ;;  %v3249_v20 = vld [vmem:[%s6052_s1 + $0x5a0] sm:$0xf]  ;;  %v3058_v21 = vor.u32 %v3910_v19, %v3057_v18  ;;  %v3958_v22 = vld [vmem:[%s6052_s1 + $0x5b4] sm:$0xf0]  ;;  %v3808_v24 = vld [vmem:[%s6052_s1 + $0x104] sm:$0xf0] }
   0x7   :  { %1253 = vmatpush.bf16.msra.mxu3 %v3274_v12  ;;  %v3250_v25 = vor.u32 %v3958_v22, %v3249_v20  ;;  %v2841_v26 = vld [vmem:[%s6052_s1 + $0x270] sm:$0xf]  ;;  %v3856_v27 = vld [vmem:[%s6052_s1 + $0x284] sm:$0xf0]  ;;  %v2650_v29 = vor.u32 %v3808_v24, %v2649_v23  ;;  %v2625_v35 = vld [vmem:[%s6052_s1 + $0xc0] sm:$0xf] }
   0x8   :  { %v3033_v28 = vld [vmem:[%s6052_s1 + $0x3f0] sm:$0xf]  ;;  %1215 = vmatpush.bf16.msra.mxu0 %v2674_v16  ;;  %v3904_v30 = vld [vmem:[%s6052_s1 + $0x404] sm:$0xf0]  ;;  %v2842_v33 = vor.u32 %v3856_v27, %v2841_v26  ;;  %v3802_v36 = vld [vmem:[%s6052_s1 + $0xd4] sm:$0xf0] }
   0x9   :  { %v3225_v31 = vld [vmem:[%s6052_s1 + $0x570] sm:$0xf]  ;;  %v3952_v32 = vld [vmem:[%s6052_s1 + $0x584] sm:$0xf0]  ;;  %1228 = vmatpush.bf16.msra.mxu1 %v2866_v17  ;;  %v3034_v34 = vor.u32 %v3904_v30, %v3033_v28  ;;  %v2817_v37 = vld [vmem:[%s6052_s1 + $0x240] sm:$0xf]  ;;  %v2626_v44 = vor.u32 %v3802_v36, %v2625_v35 }
   0xa   :  { %1241 = vmatpush.bf16.msra.mxu2 %v3058_v21  ;;  %v3226_v38 = vor.u32 %v3952_v32, %v3225_v31  ;;  %v3850_v39 = vld [vmem:[%s6052_s1 + $0x254] sm:$0xf0]  ;;  %v3009_v40 = vld [vmem:[%s6052_s1 + $0x3c0] sm:$0xf]  ;;  %v2601_v47 = vld [vmem:[%s6052_s1 + $0x90] sm:$0xf] }
   0xb   :  { %1254 = vmatpush.bf16.msra.mxu3 %v3250_v25  ;;  %v3898_v41 = vld [vmem:[%s6052_s1 + $0x3d4] sm:$0xf0]  ;;  %v3201_v42 = vld [vmem:[%s6052_s1 + $0x540] sm:$0xf]  ;;  %v2818_v45 = vor.u32 %v3850_v39, %v2817_v37  ;;  %v3796_v48 = vld [vmem:[%s6052_s1 + $0xa4] sm:$0xf0] }
   0xc   :  { %v3946_v43 = vld [vmem:[%s6052_s1 + $0x554] sm:$0xf0]  ;;  %1216 = vmatpush.bf16.msra.mxu0 %v2650_v29  ;;  %v3010_v46 = vor.u32 %v3898_v41, %v3009_v40  ;;  %v2793_v49 = vld [vmem:[%s6052_s1 + $0x210] sm:$0xf]  ;;  %v3844_v51 = vld [vmem:[%s6052_s1 + $0x224] sm:$0xf0]  ;;  %v2602_v56 = vor.u32 %v3796_v48, %v2601_v47 }
   0xd   :  { %1229 = vmatpush.bf16.msra.mxu1 %v2842_v33  ;;  %v3202_v50 = vor.u32 %v3946_v43, %v3201_v42  ;;  %v2985_v52 = vld [vmem:[%s6052_s1 + $0x390] sm:$0xf]  ;;  %v3892_v53 = vld [vmem:[%s6052_s1 + $0x3a4] sm:$0xf0]  ;;  %v2794_v57 = vor.u32 %v3844_v51, %v2793_v49  ;;  %v2577_v59 = vld [vmem:[%s6052_s1 + $0x60] sm:$0xf] }
   0xe   :  { %1242 = vmatpush.bf16.msra.mxu2 %v3034_v34  ;;  %v3177_v54 = vld [vmem:[%s6052_s1 + $0x510] sm:$0xf]  ;;  %v3940_v55 = vld [vmem:[%s6052_s1 + $0x524] sm:$0xf0]  ;;  %v2986_v58 = vor.u32 %v3892_v53, %v2985_v52  ;;  %v3790_v60 = vld [vmem:[%s6052_s1 + $0x74] sm:$0xf0] }
   0xf   :  { %1255 = vmatpush.bf16.msra.mxu3 %v3226_v38  ;;  %v2769_v61 = vld [vmem:[%s6052_s1 + $0x1e0] sm:$0xf]  ;;  %v3178_v62 = vor.u32 %v3940_v55, %v3177_v54  ;;  %v3838_v63 = vld [vmem:[%s6052_s1 + $0x1f4] sm:$0xf0]  ;;  %v2578_v4 = vor.u32 %v3790_v60, %v2577_v59  ;;  %v2553_v7 = vld [vmem:[%s6052_s1 + $0x30] sm:$0xf] }
  0x10   :  { %1217 = vmatpush.bf16.msra.mxu0 %v2626_v44  ;;  %v2961_v0 = vld [vmem:[%s6052_s1 + $0x360] sm:$0xf]  ;;  %v3886_v1 = vld [vmem:[%s6052_s1 + $0x374] sm:$0xf0]  ;;  %v2770_v5 = vor.u32 %v3838_v63, %v2769_v61  ;;  %v3784_v8 = vld [vmem:[%s6052_s1 + $0x44] sm:$0xf0] }
  0x11   :  { %1230 = vmatpush.bf16.msra.mxu1 %v2818_v45  ;;  %v3153_v2 = vld [vmem:[%s6052_s1 + $0x4e0] sm:$0xf]  ;;  %v3934_v3 = vld [vmem:[%s6052_s1 + $0x4f4] sm:$0xf0]  ;;  %v2962_v6 = vor.u32 %v3886_v1, %v2961_v0  ;;  %v2745_v9 = vld [vmem:[%s6052_s1 + $0x1b0] sm:$0xf]  ;;  %v2554_v16 = vor.u32 %v3784_v8, %v2553_v7 }
  0x12   :  { %1243 = vmatpush.bf16.msra.mxu2 %v3010_v46  ;;  %v3154_v10 = vor.u32 %v3934_v3, %v3153_v2  ;;  %v3832_v11 = vld [vmem:[%s6052_s1 + $0x1c4] sm:$0xf0]  ;;  %v2937_v12 = vld [vmem:[%s6052_s1 + $0x330] sm:$0xf]  ;;  %v2529_v17 = vld [vmem:[%s6052_s1] sm:$0xf] }
  0x13   :  { %1256 = vmatpush.bf16.msra.mxu3 %v3202_v50  ;;  %v3880_v13 = vld [vmem:[%s6052_s1 + $0x344] sm:$0xf0]  ;;  %v3129_v14 = vld [vmem:[%s6052_s1 + $0x4b0] sm:$0xf]  ;;  %v3778_v18 = vld [vmem:[%s6052_s1 + $0x14] sm:$0xf0]  ;;  %v2746_v19 = vor.u32 %v3832_v11, %v2745_v9 }
  0x14   :  { %1218 = vmatpush.bf16.msra.mxu0 %v2602_v56  ;;  %v3928_v15 = vld [vmem:[%s6052_s1 + $0x4c4] sm:$0xf0]  ;;  %v2938_v20 = vor.u32 %v3880_v13, %v2937_v12  ;;  %v2721_v21 = vld [vmem:[%s6052_s1 + $0x180] sm:$0xf]  ;;  %v3826_v22 = vld [vmem:[%s6052_s1 + $0x194] sm:$0xf0]  ;;  %v2530_v31 = vor.u32 %v3778_v18, %v2529_v17 }
  0x15   :  { %1231 = vmatpush.bf16.msra.mxu1 %v2794_v57  ;;  %v2913_v23 = vld [vmem:[%s6052_s1 + $0x300] sm:$0xf]  ;;  %v3130_v24 = vor.u32 %v3928_v15, %v3129_v14  ;;  %v3874_v25 = vld [vmem:[%s6052_s1 + $0x314] sm:$0xf0]  ;;  %v3817_v28 = vld [vmem:[%s6052_s1 + $0x154] sm:$0xf]  ;;  %v2722_v35 = vor.u32 %v3826_v22, %v2721_v21 }
  0x16   :  { %1244 = vmatpush.bf16.msra.mxu2 %v2986_v58  ;;  %v3105_v26 = vld [vmem:[%s6052_s1 + $0x480] sm:$0xf]  ;;  %v3922_v27 = vld [vmem:[%s6052_s1 + $0x494] sm:$0xf0]  ;;  %v2699_v29 = vld [vmem:[%s6052_s1 + $0x168] sm:$0xf0]  ;;  %v2914_v36 = vor.u32 %v3874_v25, %v2913_v23 }
  0x17   :  { %1257 = vmatpush.bf16.msra.mxu3 %v3178_v62  ;;  %v3865_v30 = vld [vmem:[%s6052_s1 + $0x2d4] sm:$0xf]  ;;  %v2891_v32 = vld [vmem:[%s6052_s1 + $0x2e8] sm:$0xf0]  ;;  %v3106_v39 = vor.u32 %v3922_v27, %v3105_v26  ;;  %v2702_v40 = vor.u32 %v3817_v28, %v2699_v29  ;;  %v3811_v43 = vld [vmem:[%s6052_s1 + $0x124] sm:$0xf] }
  0x18   :  { %1219 = vmatpush.bf16.msra.mxu0 %v2578_v4  ;;  %v3913_v33 = vld [vmem:[%s6052_s1 + $0x454] sm:$0xf]  ;;  %v3083_v34 = vld [vmem:[%s6052_s1 + $0x468] sm:$0xf0]  ;;  %v2894_v41 = vor.u32 %v3865_v30, %v2891_v32  ;;  %v2675_v44 = vld [vmem:[%s6052_s1 + $0x138] sm:$0xf0] }
  0x19   :  { %1232 = vmatpush.bf16.msra.mxu1 %v2770_v5  ;;  %v3961_v37 = vld [vmem:[%s6052_s1 + $0x5d4] sm:$0xf]  ;;  %v3275_v38 = vld [vmem:[%s6052_s1 + $0x5e8] sm:$0xf0]  ;;  %v3086_v42 = vor.u32 %v3913_v33, %v3083_v34  ;;  %v3859_v45 = vld [vmem:[%s6052_s1 + $0x2a4] sm:$0xf]  ;;  %v2678_v52 = vor.u32 %v3811_v43, %v2675_v44 }
  0x1a   :  { %1245 = vmatpush.bf16.msra.mxu2 %v2962_v6  ;;  %v3278_v46 = vor.u32 %v3961_v37, %v3275_v38  ;;  %v2867_v47 = vld [vmem:[%s6052_s1 + $0x2b8] sm:$0xf0]  ;;  %v3907_v48 = vld [vmem:[%s6052_s1 + $0x424] sm:$0xf]  ;;  %v3805_v53 = vld [vmem:[%s6052_s1 + $0xf4] sm:$0xf] }
  0x1b   :  { %1258 = vmatpush.bf16.msra.mxu3 %v3154_v10  ;;  %v3059_v49 = vld [vmem:[%s6052_s1 + $0x438] sm:$0xf0]  ;;  %v3955_v50 = vld [vmem:[%s6052_s1 + $0x5a4] sm:$0xf]  ;;  %v2651_v54 = vld [vmem:[%s6052_s1 + $0x108] sm:$0xf0]  ;;  %v2870_v55 = vor.u32 %v3859_v45, %v2867_v47 }
  0x1c   :  { %1220 = vmatpush.bf16.msra.mxu0 %v2554_v16  ;;  %v3251_v51 = vld [vmem:[%s6052_s1 + $0x5b8] sm:$0xf0]  ;;  %v3062_v56 = vor.u32 %v3907_v48, %v3059_v49  ;;  %v3853_v57 = vld [vmem:[%s6052_s1 + $0x274] sm:$0xf]  ;;  %v2843_v58 = vld [vmem:[%s6052_s1 + $0x288] sm:$0xf0]  ;;  %v2654_v6 = vor.u32 %v3805_v53, %v2651_v54 }
  0x1d   :  { %1233 = vmatpush.bf16.msra.mxu1 %v2746_v19  ;;  %v33_v59 = vld [vmem:[%s6053_s0 + $0x8] sm:$0xff]  ;;  %v3254_v60 = vor.u32 %v3955_v50, %v3251_v51  ;;  %v3901_v61 = vld [vmem:[%s6052_s1 + $0x3f4] sm:$0xf]  ;;  %v32_v0 = vld [vmem:[%s6053_s0] sm:$0xff]  ;;  %v2846_v9 = vor.u32 %v3853_v57, %v2843_v58 }
  0x1e   :  { %1246 = vmatpush.bf16.msra.mxu2 %v2938_v20  ;;  %v3035_v62 = vld [vmem:[%s6052_s1 + $0x408] sm:$0xf0]  ;;  %v244_v63 = vunpack.c.l.b16 %v33_v59  ;;  %v245_v1 = vunpack.c.h.b16 %v33_v59  ;;  %v3949_v2 = vld [vmem:[%s6052_s1 + $0x574] sm:$0xf]  ;;  %v242_v4 = vunpack.c.l.b16 %v32_v0  ;;  %v243_v5 = vunpack.c.h.b16 %v32_v0  ;;  %v3799_v11 = vld [vmem:[%s6052_s1 + $0xc4] sm:$0xf] }
  0x1f   :  { %1259 = vmatpush.bf16.msra.mxu3 %v3130_v24  ;;  %v3227_v3 = vld [vmem:[%s6052_s1 + $0x588] sm:$0xf0]  ;;  %v3038_v10 = vor.u32 %v3901_v61, %v3035_v62  ;;  %v2627_v12 = vld [vmem:[%s6052_s1 + $0xd8] sm:$0xf0]  ;;  %v3847_v13 = vld [vmem:[%s6052_s1 + $0x244] sm:$0xf] }
  0x20   :  { %1221 = vmatpush.bf16.msra.mxu0 %v2530_v31  ;;  %v4429_v7 = vpack.c.b16 %v244_v63, %v244_v63  ;;  %v4431_v8 = vpack.c.b16 %v245_v1, %v245_v1  ;;  %v4442_v14 = vpack.c.b16 %v242_v4, %v242_v4  ;;  %v3230_v15 = vor.u32 %v3949_v2, %v3227_v3  ;;  %v2819_v16 = vld [vmem:[%s6052_s1 + $0x258] sm:$0xf0]  ;;  %v3895_v17 = vld [vmem:[%s6052_s1 + $0x3c4] sm:$0xf]  ;;  %v3793_v25 = vld [vmem:[%s6052_s1 + $0x94] sm:$0xf] }
  0x21   :  { %1234 = vmatpush.bf16.msra.mxu1 %v2722_v35  ;;  %v3011_v18 = vld [vmem:[%s6052_s1 + $0x3d8] sm:$0xf0]  ;;  %v4454_v19 = vpack.c.b16 %v243_v5, %v243_v5  ;;  %v3943_v20 = vld [vmem:[%s6052_s1 + $0x544] sm:$0xf]  ;;  %v2630_v22 = vor.u32 %v3799_v11, %v2627_v12  ;;  %v2822_v23 = vor.u32 %v3847_v13, %v2819_v16  ;;  %v2603_v26 = vld [vmem:[%s6052_s1 + $0xa8] sm:$0xf0] }
  0x22   :  { %1247 = vmatpush.bf16.msra.mxu2 %v2914_v36  ;;  %v3203_v21 = vld [vmem:[%s6052_s1 + $0x558] sm:$0xf0]  ;;  %v3014_v24 = vor.u32 %v3895_v17, %v3011_v18  ;;  %v3841_v27 = vld [vmem:[%s6052_s1 + $0x214] sm:$0xf]  ;;  %v2795_v29 = vld [vmem:[%s6052_s1 + $0x228] sm:$0xf0]  ;;  %v2606_v34 = vor.u32 %v3793_v25, %v2603_v26 }
  0x23   :  { %1260 = vmatpush.bf16.msra.mxu3 %v3106_v39  ;;  %1222 = vmatmul.bf16.vlgmr.msra.gmra.mxu0 %v4442_v14  ;;  %v3206_v28 = vor.u32 %v3943_v20, %v3203_v21  ;;  %v3889_v30 = vld [vmem:[%s6052_s1 + $0x394] sm:$0xf]  ;;  %v2987_v31 = vld [vmem:[%s6052_s1 + $0x3a8] sm:$0xf0]  ;;  %v2798_v35 = vor.u32 %v3841_v27, %v2795_v29  ;;  %v3787_v37 = vld [vmem:[%s6052_s1 + $0x64] sm:$0xf] }
  0x24   :  { %1266 = vmatpush.bf16.msrb.mxu0 %v2702_v40  ;;  %1235 = vmatmul.bf16.vlgmr.msra.gmra.mxu1 %v4454_v19  ;;  %v3937_v32 = vld [vmem:[%s6052_s1 + $0x514] sm:$0xf]  ;;  %v3179_v33 = vld [vmem:[%s6052_s1 + $0x528] sm:$0xf0]  ;;  %v2990_v36 = vor.u32 %v3889_v30, %v2987_v31  ;;  %v2579_v38 = vld [vmem:[%s6052_s1 + $0x78] sm:$0xf0] }
  0x25   :  { %1279 = vmatpush.bf16.msrb.mxu1 %v2894_v41  ;;  %1248 = vmatmul.bf16.vlgmr.msra.gmra.mxu2 %v4429_v7  ;;  %v3835_v39 = vld [vmem:[%s6052_s1 + $0x1e4] sm:$0xf]  ;;  %v3182_v40 = vor.u32 %v3937_v32, %v3179_v33  ;;  %v2771_v41 = vld [vmem:[%s6052_s1 + $0x1f8] sm:$0xf0]  ;;  %v3781_v49 = vld [vmem:[%s6052_s1 + $0x34] sm:$0xf] }
  0x26   :  { %1292 = vmatpush.bf16.msrb.mxu2 %v3086_v42  ;;  %1261 = vmatmul.bf16.vlgmr.msra.gmra.mxu3 %v4431_v8  ;;  %v3883_v42 = vld [vmem:[%s6052_s1 + $0x364] sm:$0xf]  ;;  %v2963_v43 = vld [vmem:[%s6052_s1 + $0x378] sm:$0xf0]  ;;  %v2774_v47 = vor.u32 %v3835_v39, %v2771_v41  ;;  %v2555_v50 = vld [vmem:[%s6052_s1 + $0x48] sm:$0xf0] }
  0x27   :  { %1305 = vmatpush.bf16.msrb.mxu3 %v3278_v46  ;;  %v3931_v44 = vld [vmem:[%s6052_s1 + $0x4e4] sm:$0xf]  ;;  %v3155_v45 = vld [vmem:[%s6052_s1 + $0x4f8] sm:$0xf0]  ;;  %v2582_v46 = vor.u32 %v3787_v37, %v2579_v38  ;;  %v2966_v48 = vor.u32 %v3883_v42, %v2963_v43  ;;  %v3829_v51 = vld [vmem:[%s6052_s1 + $0x1b4] sm:$0xf]  ;;  %v2558_v58 = vor.u32 %v3781_v49, %v2555_v50 }
  0x28   :  { %1267 = vmatpush.bf16.msrb.mxu0 %v2678_v52  ;;  %v3158_v52 = vor.u32 %v3931_v44, %v3155_v45  ;;  %v2747_v53 = vld [vmem:[%s6052_s1 + $0x1c8] sm:$0xf0]  ;;  %v3877_v54 = vld [vmem:[%s6052_s1 + $0x334] sm:$0xf]  ;;  %v3775_v59 = vld [vmem:[%s6052_s1 + $0x4] sm:$0xf] }
  0x29   :  { %1280 = vmatpush.bf16.msrb.mxu1 %v2870_v55  ;;  %v2939_v55 = vld [vmem:[%s6052_s1 + $0x348] sm:$0xf0]  ;;  %v2750_v61 = vor.u32 %v3829_v51, %v2747_v53  ;;  %v3823_v63 = vld [vmem:[%s6052_s1 + $0x184] sm:$0xf]  ;;  %v2723_v0 = vld [vmem:[%s6052_s1 + $0x198] sm:$0xf0] }
  0x2a   :  { %1293 = vmatpush.bf16.msrb.mxu2 %v3062_v56  ;;  %v3925_v56 = vld [vmem:[%s6052_s1 + $0x4b4] sm:$0xf]  ;;  %v3131_v57 = vld [vmem:[%s6052_s1 + $0x4c8] sm:$0xf0]  ;;  %v2942_v62 = vor.u32 %v3877_v54, %v2939_v55  ;;  %v3871_v1 = vld [vmem:[%s6052_s1 + $0x304] sm:$0xf]  ;;  %v2726_v16 = vor.u32 %v3823_v63, %v2723_v0 }
  0x2b   :  { %1306 = vmatpush.bf16.msrb.mxu3 %v3254_v60  ;;  %v2531_v60 = vld [vmem:[%s6052_s1 + $0x18] sm:$0xf0]  ;;  %v3134_v2 = vor.u32 %v3925_v56, %v3131_v57  ;;  %v3919_v4 = vld [vmem:[%s6052_s1 + $0x484] sm:$0xf]  ;;  %v3869_v12 = vld [vmem:[%s6052_s1 + $0x2ec] sm:$0xf0] }
  0x2c   :  { %1268 = vmatpush.bf16.msrb.mxu0 %v2654_v6  ;;  %v2915_v3 = vld [vmem:[%s6052_s1 + $0x318] sm:$0xf0]  ;;  %v2705_v6 = vld [vmem:[%s6052_s1 + $0x158] sm:$0xf]  ;;  %v2534_v11 = vor.u32 %v3775_v59, %v2531_v60  ;;  %v3965_v20 = vld [vmem:[%s6052_s1 + $0x5ec] sm:$0xf0] }
  0x2d   :  { %1281 = vmatpush.bf16.msrb.mxu1 %v2846_v9  ;;  %v3107_v5 = vld [vmem:[%s6052_s1 + $0x498] sm:$0xf0]  ;;  %v3821_v9 = vld [vmem:[%s6052_s1 + $0x16c] sm:$0xf0]  ;;  %v3089_v13 = vld [vmem:[%s6052_s1 + $0x458] sm:$0xf]  ;;  %v2918_v17 = vor.u32 %v3871_v1, %v2915_v3 }
  0x2e   :  { %1294 = vmatpush.bf16.msrb.mxu2 %v3038_v10  ;;  %v2897_v10 = vld [vmem:[%s6052_s1 + $0x2d8] sm:$0xf]  ;;  %v3110_v21 = vor.u32 %v3919_v4, %v3107_v5  ;;  %v2681_v25 = vld [vmem:[%s6052_s1 + $0x128] sm:$0xf]  ;;  %v3815_v26 = vld [vmem:[%s6052_s1 + $0x13c] sm:$0xf0] }
  0x2f   :  { %1307 = vmatpush.bf16.msrb.mxu3 %v3230_v15  ;;  %v3917_v15 = vld [vmem:[%s6052_s1 + $0x46c] sm:$0xf0]  ;;  %v3281_v18 = vld [vmem:[%s6052_s1 + $0x5d8] sm:$0xf]  ;;  %v2873_v27 = vld [vmem:[%s6052_s1 + $0x2a8] sm:$0xf] }
  0x30   :  { %1269 = vmatpush.bf16.msrb.mxu0 %v2630_v22  ;;  %v2706_v22 = vor.u32 %v3821_v9, %v2705_v6  ;;  %v3863_v29 = vld [vmem:[%s6052_s1 + $0x2bc] sm:$0xf0]  ;;  %v3065_v30 = vld [vmem:[%s6052_s1 + $0x428] sm:$0xf]  ;;  %v2657_v37 = vld [vmem:[%s6052_s1 + $0xf8] sm:$0xf] }
  0x31   :  { %1282 = vmatpush.bf16.msrb.mxu1 %v2822_v23  ;;  %v2898_v23 = vor.u32 %v3869_v12, %v2897_v10  ;;  %v3911_v31 = vld [vmem:[%s6052_s1 + $0x43c] sm:$0xf0]  ;;  %v3257_v32 = vld [vmem:[%s6052_s1 + $0x5a8] sm:$0xf]  ;;  %v3809_v38 = vld [vmem:[%s6052_s1 + $0x10c] sm:$0xf0] }
  0x32   :  { %1295 = vmatpush.bf16.msrb.mxu2 %v3014_v24  ;;  %v3090_v24 = vor.u32 %v3917_v15, %v3089_v13  ;;  %v3959_v33 = vld [vmem:[%s6052_s1 + $0x5bc] sm:$0xf0]  ;;  %v2849_v39 = vld [vmem:[%s6052_s1 + $0x278] sm:$0xf]  ;;  %v3857_v41 = vld [vmem:[%s6052_s1 + $0x28c] sm:$0xf0] }
  0x33   :  { %1308 = vmatpush.bf16.msrb.mxu3 %v3206_v28  ;;  %v3282_v28 = vor.u32 %v3965_v20, %v3281_v18  ;;  %v3041_v42 = vld [vmem:[%s6052_s1 + $0x3f8] sm:$0xf]  ;;  %v3905_v43 = vld [vmem:[%s6052_s1 + $0x40c] sm:$0xf0]  ;;  %v2633_v49 = vld [vmem:[%s6052_s1 + $0xc8] sm:$0xf] }
  0x34   :  { %1270 = vmatpush.bf16.msrb.mxu0 %v2606_v34  ;;  %v2682_v34 = vor.u32 %v3815_v26, %v2681_v25  ;;  %v3233_v44 = vld [vmem:[%s6052_s1 + $0x578] sm:$0xf]  ;;  %v3953_v45 = vld [vmem:[%s6052_s1 + $0x58c] sm:$0xf0]  ;;  %v3803_v50 = vld [vmem:[%s6052_s1 + $0xdc] sm:$0xf0] }
  0x35   :  { %1283 = vmatpush.bf16.msrb.mxu1 %v2798_v35  ;;  %v2874_v35 = vor.u32 %v3863_v29, %v2873_v27  ;;  %v2825_v51 = vld [vmem:[%s6052_s1 + $0x248] sm:$0xf]  ;;  %v3851_v53 = vld [vmem:[%s6052_s1 + $0x25c] sm:$0xf0]  ;;  %v2801_v63 = vld [vmem:[%s6052_s1 + $0x218] sm:$0xf] }
  0x36   :  { %1296 = vmatpush.bf16.msrb.mxu2 %v2990_v36  ;;  %v3066_v36 = vor.u32 %v3911_v31, %v3065_v30  ;;  %v3017_v54 = vld [vmem:[%s6052_s1 + $0x3c8] sm:$0xf]  ;;  %v3899_v55 = vld [vmem:[%s6052_s1 + $0x3dc] sm:$0xf0]  ;;  %v2826_v59 = vor.u32 %v3851_v53, %v2825_v51  ;;  %v3845_v1 = vld [vmem:[%s6052_s1 + $0x22c] sm:$0xf0] }
  0x37   :  { %1309 = vmatpush.bf16.msrb.mxu3 %v3182_v40  ;;  %v3258_v40 = vor.u32 %v3959_v33, %v3257_v32  ;;  %v3209_v56 = vld [vmem:[%s6052_s1 + $0x548] sm:$0xf]  ;;  %v3947_v57 = vld [vmem:[%s6052_s1 + $0x55c] sm:$0xf0]  ;;  %v3018_v60 = vor.u32 %v3899_v55, %v3017_v54  ;;  %v3893_v3 = vld [vmem:[%s6052_s1 + $0x3ac] sm:$0xf0]  ;;  %v2802_v9 = vor.u32 %v3845_v1, %v2801_v63 }
  0x38   :  { %1271 = vmatpush.bf16.msrb.mxu0 %v2582_v46  ;;  %v2658_v46 = vor.u32 %v3809_v38, %v2657_v37  ;;  %v3210_v0 = vor.u32 %v3947_v57, %v3209_v56  ;;  %v3185_v4 = vld [vmem:[%s6052_s1 + $0x518] sm:$0xf]  ;;  %v3941_v5 = vld [vmem:[%s6052_s1 + $0x52c] sm:$0xf0]  ;;  %v3791_v12 = vld [vmem:[%s6052_s1 + $0x7c] sm:$0xf0] }
  0x39   :  { %1284 = vmatpush.bf16.msrb.mxu1 %v2774_v47  ;;  %v2850_v47 = vor.u32 %v3857_v41, %v2849_v39  ;;  %v2777_v13 = vld [vmem:[%s6052_s1 + $0x1e8] sm:$0xf]  ;;  %v3186_v15 = vor.u32 %v3941_v5, %v3185_v4  ;;  %v3887_v18 = vld [vmem:[%s6052_s1 + $0x37c] sm:$0xf0]  ;;  %v2561_v25 = vld [vmem:[%s6052_s1 + $0x38] sm:$0xf] }
  0x3a   :  { %1297 = vmatpush.bf16.msrb.mxu2 %v2966_v48  ;;  %v3042_v48 = vor.u32 %v3905_v43, %v3041_v42  ;;  %v3161_v20 = vld [vmem:[%s6052_s1 + $0x4e8] sm:$0xf]  ;;  %v3785_v26 = vld [vmem:[%s6052_s1 + $0x4c] sm:$0xf0]  ;;  %v2753_v27 = vld [vmem:[%s6052_s1 + $0x1b8] sm:$0xf] }
  0x3b   :  { %1310 = vmatpush.bf16.msrb.mxu3 %v3158_v52  ;;  %v3234_v52 = vor.u32 %v3953_v45, %v3233_v44  ;;  %v3833_v29 = vld [vmem:[%s6052_s1 + $0x1cc] sm:$0xf0]  ;;  %v2945_v30 = vld [vmem:[%s6052_s1 + $0x338] sm:$0xf]  ;;  %v2729_v39 = vld [vmem:[%s6052_s1 + $0x188] sm:$0xf] }
  0x3c   :  { %1272 = vmatpush.bf16.msrb.mxu0 %v2558_v58  ;;  %v2634_v58 = vor.u32 %v3803_v50, %v2633_v49  ;;  %v3881_v31 = vld [vmem:[%s6052_s1 + $0x34c] sm:$0xf0]  ;;  %v3137_v32 = vld [vmem:[%s6052_s1 + $0x4b8] sm:$0xf]  ;;  %v2754_v37 = vor.u32 %v3833_v29, %v2753_v27  ;;  %v2921_v41 = vld [vmem:[%s6052_s1 + $0x308] sm:$0xf] }
  0x3d   :  { %1285 = vmatpush.bf16.msrb.mxu1 %v2750_v61  ;;  %v2609_v61 = vld [vmem:[%s6052_s1 + $0x98] sm:$0xf]  ;;  %v3929_v33 = vld [vmem:[%s6052_s1 + $0x4cc] sm:$0xf0]  ;;  %v2946_v38 = vor.u32 %v3881_v31, %v2945_v30  ;;  %v3875_v43 = vld [vmem:[%s6052_s1 + $0x31c] sm:$0xf0] }
  0x3e   :  { %1298 = vmatpush.bf16.msrb.mxu2 %v2942_v62  ;;  %v3797_v62 = vld [vmem:[%s6052_s1 + $0xac] sm:$0xf0]  ;;  %v3138_v42 = vor.u32 %v3929_v33, %v3137_v32  ;;  %v3113_v44 = vld [vmem:[%s6052_s1 + $0x488] sm:$0xf]  ;;  %v3923_v45 = vld [vmem:[%s6052_s1 + $0x49c] sm:$0xf0]  ;;  %v2922_v54 = vor.u32 %v3875_v43, %v2921_v41 }
  0x3f   :  { %1311 = vmatpush.bf16.msrb.mxu3 %v3134_v2  ;;  %v2993_v2 = vld [vmem:[%s6052_s1 + $0x398] sm:$0xf]  ;;  %v2610_v6 = vor.u32 %v3797_v62, %v2609_v61  ;;  %v2899_v50 = vld [vmem:[%s6052_s1 + $0x2f0] sm:$0xf0]  ;;  %v3914_v51 = vld [vmem:[%s6052_s1 + $0x45c] sm:$0xf]  ;;  %v3114_v57 = vor.u32 %v3923_v45, %v3113_v44 }
  0x40   :  { %1273 = vmatpush.bf16.msrb.mxu0 %v2534_v11  ;;  %v2994_v10 = vor.u32 %v3893_v3, %v2993_v2  ;;  %v2585_v11 = vld [vmem:[%s6052_s1 + $0x68] sm:$0xf]  ;;  %v3962_v55 = vld [vmem:[%s6052_s1 + $0x5dc] sm:$0xf]  ;;  %v3283_v56 = vld [vmem:[%s6052_s1 + $0x5f0] sm:$0xf0] }
  0x41   :  { %1286 = vmatpush.bf16.msrb.mxu1 %v2726_v16  ;;  %v3839_v16 = vld [vmem:[%s6052_s1 + $0x1fc] sm:$0xf0]  ;;  %v3812_v61 = vld [vmem:[%s6052_s1 + $0x12c] sm:$0xf]  ;;  %v2683_v62 = vld [vmem:[%s6052_s1 + $0x140] sm:$0xf0] }
  0x42   :  { %1299 = vmatpush.bf16.msrb.mxu2 %v2918_v17  ;;  %v2969_v17 = vld [vmem:[%s6052_s1 + $0x368] sm:$0xf]  ;;  %v3860_v63 = vld [vmem:[%s6052_s1 + $0x2ac] sm:$0xf]  ;;  %v2875_v1 = vld [vmem:[%s6052_s1 + $0x2c0] sm:$0xf0] }
  0x43   :  { %1312 = vmatpush.bf16.msrb.mxu3 %v3110_v21  ;;  %1274 = vmatmul.bf16.vlgmr.msrb.gmra.mxu0 %v4442_v14  ;;  %v3935_v21 = vld [vmem:[%s6052_s1 + $0x4fc] sm:$0xf0]  ;;  %v3908_v2 = vld [vmem:[%s6052_s1 + $0x42c] sm:$0xf]  ;;  %v3067_v3 = vld [vmem:[%s6052_s1 + $0x440] sm:$0xf0] }
  0x44   :  { %1318 = vmatpush.bf16.msra.mxu0 %v2706_v22  ;;  %1287 = vmatmul.bf16.vlgmr.msrb.gmra.mxu1 %v4454_v19  ;;  %v2586_v22 = vor.u32 %v3791_v12, %v2585_v11  ;;  %v3956_v4 = vld [vmem:[%s6052_s1 + $0x5ac] sm:$0xf]  ;;  %v3259_v5 = vld [vmem:[%s6052_s1 + $0x5c0] sm:$0xf0]  ;;  %v3806_v11 = vld [vmem:[%s6052_s1 + $0xfc] sm:$0xf] }
  0x45   :  { %1331 = vmatpush.bf16.msra.mxu1 %v2898_v23  ;;  %1300 = vmatmul.bf16.vlgmr.msrb.gmra.mxu2 %v4429_v7  ;;  %v2778_v23 = vor.u32 %v3839_v16, %v2777_v13  ;;  %v2659_v12 = vld [vmem:[%s6052_s1 + $0x110] sm:$0xf0]  ;;  %v3854_v13 = vld [vmem:[%s6052_s1 + $0x27c] sm:$0xf]  ;;  %v3848_v27 = vld [vmem:[%s6052_s1 + $0x24c] sm:$0xf] }
  0x46   :  { %1344 = vmatpush.bf16.msra.mxu2 %v3090_v24  ;;  %1313 = vmatmul.bf16.vlgmr.msrb.gmra.mxu3 %v4431_v8  ;;  %v2970_v24 = vor.u32 %v3887_v18, %v2969_v17  ;;  %v2851_v16 = vld [vmem:[%s6052_s1 + $0x290] sm:$0xf0]  ;;  %v3902_v17 = vld [vmem:[%s6052_s1 + $0x3fc] sm:$0xf]  ;;  %v2827_v29 = vld [vmem:[%s6052_s1 + $0x260] sm:$0xf0] }
  0x47   :  { %1357 = vmatpush.bf16.msra.mxu3 %v3282_v28  ;;  %v3162_v28 = vor.u32 %v3935_v21, %v3161_v20  ;;  %v3043_v18 = vld [vmem:[%s6052_s1 + $0x410] sm:$0xf0]  ;;  %v3950_v20 = vld [vmem:[%s6052_s1 + $0x57c] sm:$0xf]  ;;  %v3896_v30 = vld [vmem:[%s6052_s1 + $0x3cc] sm:$0xf] }
  0x48   :  { %1319 = vmatpush.bf16.msra.mxu0 %v2682_v34  ;;  %v2562_v34 = vor.u32 %v3785_v26, %v2561_v25  ;;  %v3235_v21 = vld [vmem:[%s6052_s1 + $0x590] sm:$0xf0]  ;;  %v3800_v25 = vld [vmem:[%s6052_s1 + $0xcc] sm:$0xf]  ;;  %v2635_v26 = vld [vmem:[%s6052_s1 + $0xe0] sm:$0xf0] }
  0x49   :  { %1332 = vmatpush.bf16.msra.mxu1 %v2874_v35  ;;  %v2537_v35 = vld [vmem:[%s6052_s1 + $0x8] sm:$0xf]  ;;  %v3019_v31 = vld [vmem:[%s6052_s1 + $0x3e0] sm:$0xf0]  ;;  %v3944_v32 = vld [vmem:[%s6052_s1 + $0x54c] sm:$0xf] }
  0x4a   :  { %1345 = vmatpush.bf16.msra.mxu2 %v3066_v36  ;;  %v3779_v36 = vld [vmem:[%s6052_s1 + $0x1c] sm:$0xf0]  ;;  %v3211_v33 = vld [vmem:[%s6052_s1 + $0x560] sm:$0xf0]  ;;  %v2803_v41 = vld [vmem:[%s6052_s1 + $0x230] sm:$0xf0] }
  0x4b   :  { %1358 = vmatpush.bf16.msra.mxu3 %v3258_v40  ;;  %v3827_v40 = vld [vmem:[%s6052_s1 + $0x19c] sm:$0xf0]  ;;  %v2538_v49 = vor.u32 %v3779_v36, %v2537_v35  ;;  %v2830_v35 = vor.u32 %v3848_v27, %v2827_v29  ;;  %v3022_v36 = vor.u32 %v3896_v30, %v3019_v31  ;;  %v2995_v43 = vld [vmem:[%s6052_s1 + $0x3b0] sm:$0xf0]  ;;  %v3938_v44 = vld [vmem:[%s6052_s1 + $0x51c] sm:$0xf] }
  0x4c   :  { %1320 = vmatpush.bf16.msra.mxu0 %v2658_v46  ;;  %v3818_v46 = vld [vmem:[%s6052_s1 + $0x15c] sm:$0xf]  ;;  %v2730_v53 = vor.u32 %v3827_v40, %v2729_v39  ;;  %v3214_v40 = vor.u32 %v3944_v32, %v3211_v33  ;;  %v3187_v45 = vld [vmem:[%s6052_s1 + $0x530] sm:$0xf0]  ;;  %v3097_v27 = vld [vmem:[%s6052_s1 + $0x460] sm:$0xf] }
  0x4d   :  { %1333 = vmatpush.bf16.msra.mxu1 %v2850_v47  ;;  %v2707_v47 = vld [vmem:[%s6052_s1 + $0x170] sm:$0xf0]  ;;  %v3842_v39 = vld [vmem:[%s6052_s1 + $0x21c] sm:$0xf]  ;;  %v3289_v31 = vld [vmem:[%s6052_s1 + $0x5e0] sm:$0xf] }
  0x4e   :  { %1346 = vmatpush.bf16.msra.mxu2 %v3042_v48  ;;  %v3866_v48 = vld [vmem:[%s6052_s1 + $0x2dc] sm:$0xf]  ;;  %v3966_v32 = vld [vmem:[%s6052_s1 + $0x5f4] sm:$0xf0] }
  0x4f   :  { %1359 = vmatpush.bf16.msra.mxu3 %v3234_v52  ;;  %v3091_v52 = vld [vmem:[%s6052_s1 + $0x470] sm:$0xf0] }
  0x50   :  { %1321 = vmatpush.bf16.msra.mxu0 %v2634_v58  ;;  %v2710_v58 = vor.u32 %v3818_v46, %v2707_v47  ;;  %v2806_v47 = vor.u32 %v3842_v39, %v2803_v41  ;;  %v2881_v39 = vld [vmem:[%s6052_s1 + $0x2b0] sm:$0xf]  ;;  %v3864_v41 = vld [vmem:[%s6052_s1 + $0x2c4] sm:$0xf0] }
  0x51   :  { %1334 = vmatpush.bf16.msra.mxu1 %v2826_v59  ;;  %v2902_v59 = vor.u32 %v3866_v48, %v2899_v50  ;;  %v2587_v50 = vld [vmem:[%s6052_s1 + $0x80] sm:$0xf0] }
  0x52   :  { %1347 = vmatpush.bf16.msra.mxu2 %v3018_v60  ;;  %v3094_v60 = vor.u32 %v3914_v51, %v3091_v52  ;;  %v3836_v51 = vld [vmem:[%s6052_s1 + $0x1ec] sm:$0xf]  ;;  %v3190_v52 = vor.u32 %v3938_v44, %v3187_v45  ;;  %v3265_v44 = vld [vmem:[%s6052_s1 + $0x5b0] sm:$0xf]  ;;  %v3960_v45 = vld [vmem:[%s6052_s1 + $0x5c4] sm:$0xf0] }
  0x53   :  { %1360 = vmatpush.bf16.msra.mxu3 %v3210_v0  ;;  %v3286_v0 = vor.u32 %v3962_v55, %v3283_v56  ;;  %v2971_v55 = vld [vmem:[%s6052_s1 + $0x380] sm:$0xf0]  ;;  %v3932_v56 = vld [vmem:[%s6052_s1 + $0x4ec] sm:$0xf] }
  0x54   :  { %1322 = vmatpush.bf16.msra.mxu0 %v2610_v6  ;;  %v2686_v6 = vor.u32 %v3812_v61, %v2683_v62  ;;  %v3782_v61 = vld [vmem:[%s6052_s1 + $0x3c] sm:$0xf]  ;;  %v2563_v62 = vld [vmem:[%s6052_s1 + $0x50] sm:$0xf0] }
  0x55   :  { %1335 = vmatpush.bf16.msra.mxu1 %v2802_v9  ;;  %v2878_v9 = vor.u32 %v3860_v63, %v2875_v1  ;;  %v3830_v63 = vld [vmem:[%s6052_s1 + $0x1bc] sm:$0xf]  ;;  %v2755_v1 = vld [vmem:[%s6052_s1 + $0x1d0] sm:$0xf0] }
  0x56   :  { %1348 = vmatpush.bf16.msra.mxu2 %v2994_v10  ;;  %v3070_v10 = vor.u32 %v3908_v2, %v3067_v3  ;;  %v3878_v2 = vld [vmem:[%s6052_s1 + $0x33c] sm:$0xf]  ;;  %v2947_v3 = vld [vmem:[%s6052_s1 + $0x350] sm:$0xf0] }
  0x57   :  { %1361 = vmatpush.bf16.msra.mxu3 %v3186_v15  ;;  %v3262_v15 = vor.u32 %v3956_v4, %v3259_v5  ;;  %v3926_v4 = vld [vmem:[%s6052_s1 + $0x4bc] sm:$0xf]  ;;  %v3139_v5 = vld [vmem:[%s6052_s1 + $0x4d0] sm:$0xf0] }
  0x58   :  { %1323 = vmatpush.bf16.msra.mxu0 %v2586_v22  ;;  %v2662_v22 = vor.u32 %v3806_v11, %v2659_v12  ;;  %v2758_v11 = vor.u32 %v3830_v63, %v2755_v1  ;;  %v2950_v12 = vor.u32 %v3878_v2, %v2947_v3  ;;  %v2833_v63 = vld [vmem:[%s6052_s1 + $0x250] sm:$0xf]  ;;  %v3852_v1 = vld [vmem:[%s6052_s1 + $0x264] sm:$0xf0] }
  0x59   :  { %1336 = vmatpush.bf16.msra.mxu1 %v2778_v23  ;;  %v2854_v23 = vor.u32 %v3854_v13, %v2851_v16  ;;  %v3824_v13 = vld [vmem:[%s6052_s1 + $0x18c] sm:$0xf]  ;;  %v3025_v2 = vld [vmem:[%s6052_s1 + $0x3d0] sm:$0xf]  ;;  %v3900_v3 = vld [vmem:[%s6052_s1 + $0x3e4] sm:$0xf0] }
  0x5a   :  { %1349 = vmatpush.bf16.msra.mxu2 %v2970_v24  ;;  %v3046_v24 = vor.u32 %v3902_v17, %v3043_v18  ;;  %v3872_v16 = vld [vmem:[%s6052_s1 + $0x30c] sm:$0xf]  ;;  %v3142_v17 = vor.u32 %v3926_v4, %v3139_v5  ;;  %v2923_v18 = vld [vmem:[%s6052_s1 + $0x320] sm:$0xf0]  ;;  %v3217_v4 = vld [vmem:[%s6052_s1 + $0x550] sm:$0xf] }
  0x5b   :  { %1362 = vmatpush.bf16.msra.mxu3 %v3162_v28  ;;  %v3238_v28 = vor.u32 %v3950_v20, %v3235_v21  ;;  %v3920_v20 = vld [vmem:[%s6052_s1 + $0x48c] sm:$0xf]  ;;  %v3115_v21 = vld [vmem:[%s6052_s1 + $0x4a0] sm:$0xf0]  ;;  %v2926_v30 = vor.u32 %v3872_v16, %v2923_v18  ;;  %v3948_v5 = vld [vmem:[%s6052_s1 + $0x564] sm:$0xf0] }
  0x5c   :  { %1324 = vmatpush.bf16.msra.mxu0 %v2562_v34  ;;  %v2638_v34 = vor.u32 %v3800_v25, %v2635_v26  ;;  %v3870_v26 = vld [vmem:[%s6052_s1 + $0x2f4] sm:$0xf0]  ;;  %v3118_v33 = vor.u32 %v3920_v20, %v3115_v21  ;;  %v3193_v20 = vld [vmem:[%s6052_s1 + $0x520] sm:$0xf] }
  0x5d   :  { %1337 = vmatpush.bf16.msra.mxu1 %v2754_v37  ;;  %v3794_v37 = vld [vmem:[%s6052_s1 + $0x9c] sm:$0xf]  ;;  %v3846_v16 = vld [vmem:[%s6052_s1 + $0x234] sm:$0xf0] }
  0x5e   :  { %1350 = vmatpush.bf16.msra.mxu2 %v2946_v38  ;;  %v2611_v38 = vld [vmem:[%s6052_s1 + $0xb0] sm:$0xf0]  ;;  %v3894_v18 = vld [vmem:[%s6052_s1 + $0x3b4] sm:$0xf0] }
  0x5f   :  { %1363 = vmatpush.bf16.msra.mxu3 %v3138_v42  ;;  %v3890_v42 = vld [vmem:[%s6052_s1 + $0x39c] sm:$0xf]  ;;  %v2614_v46 = vor.u32 %v3794_v37, %v2611_v38  ;;  %v2689_v37 = vld [vmem:[%s6052_s1 + $0x130] sm:$0xf]  ;;  %v3816_v38 = vld [vmem:[%s6052_s1 + $0x144] sm:$0xf0] }
  0x60   :  { %1325 = vmatpush.bf16.msra.mxu0 %v2538_v49  ;;  %v2998_v48 = vor.u32 %v3890_v42, %v2995_v43  ;;  %v3788_v49 = vld [vmem:[%s6052_s1 + $0x6c] sm:$0xf]  ;;  %v3073_v42 = vld [vmem:[%s6052_s1 + $0x430] sm:$0xf]  ;;  %v3912_v43 = vld [vmem:[%s6052_s1 + $0x444] sm:$0xf0] }
  0x61   :  { %1338 = vmatpush.bf16.msra.mxu1 %v2730_v53  ;;  %v2779_v53 = vld [vmem:[%s6052_s1 + $0x200] sm:$0xf0]  ;;  %v3942_v21 = vld [vmem:[%s6052_s1 + $0x534] sm:$0xf0] }
  0x62   :  { %1351 = vmatpush.bf16.msra.mxu2 %v2922_v54  ;;  %v3884_v54 = vld [vmem:[%s6052_s1 + $0x36c] sm:$0xf] }
  0x63   :  { %1364 = vmatpush.bf16.msra.mxu3 %v3114_v57  ;;  %1326 = vmatmul.bf16.vlgmr.msra.gmra.mxu0 %v4442_v14  ;;  %v3163_v57 = vld [vmem:[%s6052_s1 + $0x500] sm:$0xf0] }
  0x64   :  { %1370 = vmatpush.bf16.msrb.mxu0 %v2710_v58  ;;  %1339 = vmatmul.bf16.vlgmr.msra.gmra.mxu1 %v4454_v19  ;;  %v2590_v58 = vor.u32 %v3788_v49, %v2587_v50  ;;  %v2665_v49 = vld [vmem:[%s6052_s1 + $0x100] sm:$0xf]  ;;  %v3810_v50 = vld [vmem:[%s6052_s1 + $0x114] sm:$0xf0] }
  0x65   :  { %1383 = vmatpush.bf16.msrb.mxu1 %v2902_v59  ;;  %1352 = vmatmul.bf16.vlgmr.msra.gmra.mxu2 %v4429_v7  ;;  %v2782_v59 = vor.u32 %v3836_v51, %v2779_v53  ;;  %v2857_v51 = vld [vmem:[%s6052_s1 + $0x280] sm:$0xf]  ;;  %v3858_v53 = vld [vmem:[%s6052_s1 + $0x294] sm:$0xf0] }
  0x66   :  { %1396 = vmatpush.bf16.msrb.mxu2 %v3094_v60  ;;  %1365 = vmatmul.bf16.vlgmr.msra.gmra.mxu3 %v4431_v8  ;;  %v2974_v60 = vor.u32 %v3884_v54, %v2971_v55  ;;  %v3049_v54 = vld [vmem:[%s6052_s1 + $0x400] sm:$0xf]  ;;  %v3906_v55 = vld [vmem:[%s6052_s1 + $0x414] sm:$0xf0] }
  0x67   :  { %1409 = vmatpush.bf16.msrb.mxu3 %v3286_v0  ;;  %v3166_v0 = vor.u32 %v3932_v56, %v3163_v57  ;;  %v3241_v56 = vld [vmem:[%s6052_s1 + $0x580] sm:$0xf]  ;;  %v3954_v57 = vld [vmem:[%s6052_s1 + $0x594] sm:$0xf0] }
  0x68   :  { %1371 = vmatpush.bf16.msrb.mxu0 %v2686_v6  ;;  %v2566_v6 = vor.u32 %v3782_v61, %v2563_v62  ;;  %v2641_v61 = vld [vmem:[%s6052_s1 + $0xd0] sm:$0xf]  ;;  %v3804_v62 = vld [vmem:[%s6052_s1 + $0xe4] sm:$0xf0] }
  0x69   :  { %1384 = vmatpush.bf16.msrb.mxu1 %v2878_v9  ;;  %v3776_v9 = vld [vmem:[%s6052_s1 + $0xc] sm:$0xf] }
  0x6a   :  { %1397 = vmatpush.bf16.msrb.mxu2 %v3070_v10  ;;  %v2539_v10 = vld [vmem:[%s6052_s1 + $0x20] sm:$0xf0] }
  0x6b   :  { %1410 = vmatpush.bf16.msrb.mxu3 %v3262_v15  ;;  %v2731_v15 = vld [vmem:[%s6052_s1 + $0x1a0] sm:$0xf0]  ;;  %v2542_v25 = vor.u32 %v3776_v9, %v2539_v10  ;;  %v2834_v9 = vor.u32 %v3852_v1, %v2833_v63  ;;  %v3026_v10 = vor.u32 %v3900_v3, %v3025_v2 }
  0x6c   :  { %1372 = vmatpush.bf16.msrb.mxu0 %v2662_v22  ;;  %v2713_v22 = vld [vmem:[%s6052_s1 + $0x160] sm:$0xf]  ;;  %v2734_v29 = vor.u32 %v3824_v13, %v2731_v15  ;;  %v3218_v15 = vor.u32 %v3948_v5, %v3217_v4  ;;  %v3915_v63 = vld [vmem:[%s6052_s1 + $0x464] sm:$0xf]  ;;  %v3291_v4 = vld [vmem:[%s6052_s1 + $0x5f8] sm:$0xf0] }
  0x6d   :  { %1385 = vmatpush.bf16.msrb.mxu1 %v2854_v23  ;;  %v3822_v23 = vld [vmem:[%s6052_s1 + $0x174] sm:$0xf0]  ;;  %v2809_v13 = vld [vmem:[%s6052_s1 + $0x220] sm:$0xf]  ;;  %v3963_v3 = vld [vmem:[%s6052_s1 + $0x5e4] sm:$0xf] }
  0x6e   :  { %1398 = vmatpush.bf16.msrb.mxu2 %v3046_v24  ;;  %v2905_v24 = vld [vmem:[%s6052_s1 + $0x2e0] sm:$0xf] }
  0x6f   :  { %1411 = vmatpush.bf16.msrb.mxu3 %v3238_v28  ;;  %v3918_v28 = vld [vmem:[%s6052_s1 + $0x474] sm:$0xf0] }
  0x70   :  { %1373 = vmatpush.bf16.msrb.mxu0 %v2638_v34  ;;  %v2714_v34 = vor.u32 %v3822_v23, %v2713_v22  ;;  %v2810_v23 = vor.u32 %v3846_v16, %v2809_v13  ;;  %v3861_v13 = vld [vmem:[%s6052_s1 + $0x2b4] sm:$0xf]  ;;  %v2883_v16 = vld [vmem:[%s6052_s1 + $0x2c8] sm:$0xf0] }
  0x71   :  { %1386 = vmatpush.bf16.msrb.mxu1 %v2830_v35  ;;  %v2906_v35 = vor.u32 %v3870_v26, %v2905_v24  ;;  %v3792_v26 = vld [vmem:[%s6052_s1 + $0x84] sm:$0xf0] }
  0x72   :  { %1399 = vmatpush.bf16.msrb.mxu2 %v3022_v36  ;;  %v3098_v36 = vor.u32 %v3918_v28, %v3097_v27  ;;  %v2785_v27 = vld [vmem:[%s6052_s1 + $0x1f0] sm:$0xf]  ;;  %v3194_v28 = vor.u32 %v3942_v21, %v3193_v20  ;;  %v3957_v20 = vld [vmem:[%s6052_s1 + $0x5b4] sm:$0xf]  ;;  %v3267_v21 = vld [vmem:[%s6052_s1 + $0x5c8] sm:$0xf0] }
  0x73   :  { %1412 = vmatpush.bf16.msrb.mxu3 %v3214_v40  ;;  %v3290_v40 = vor.u32 %v3966_v32, %v3289_v31  ;;  %v3888_v31 = vld [vmem:[%s6052_s1 + $0x384] sm:$0xf0]  ;;  %v3169_v32 = vld [vmem:[%s6052_s1 + $0x4f0] sm:$0xf] }
  0x74   :  { %1374 = vmatpush.bf16.msrb.mxu0 %v2614_v46  ;;  %v2690_v46 = vor.u32 %v3816_v38, %v2689_v37  ;;  %v2569_v37 = vld [vmem:[%s6052_s1 + $0x40] sm:$0xf]  ;;  %v3786_v38 = vld [vmem:[%s6052_s1 + $0x54] sm:$0xf0] }
  0x75   :  { %1387 = vmatpush.bf16.msrb.mxu1 %v2806_v47  ;;  %v2882_v47 = vor.u32 %v3864_v41, %v2881_v39  ;;  %v2761_v39 = vld [vmem:[%s6052_s1 + $0x1c0] sm:$0xf]  ;;  %v3834_v41 = vld [vmem:[%s6052_s1 + $0x1d4] sm:$0xf0] }
  0x76   :  { %1400 = vmatpush.bf16.msrb.mxu2 %v2998_v48  ;;  %v3074_v48 = vor.u32 %v3912_v43, %v3073_v42  ;;  %v2953_v42 = vld [vmem:[%s6052_s1 + $0x340] sm:$0xf]  ;;  %v3882_v43 = vld [vmem:[%s6052_s1 + $0x354] sm:$0xf0] }
  0x77   :  { %1413 = vmatpush.bf16.msrb.mxu3 %v3190_v52  ;;  %v3266_v52 = vor.u32 %v3960_v45, %v3265_v44  ;;  %v3145_v44 = vld [vmem:[%s6052_s1 + $0x4c0] sm:$0xf]  ;;  %v3930_v45 = vld [vmem:[%s6052_s1 + $0x4d4] sm:$0xf0] }
  0x78   :  { %1375 = vmatpush.bf16.msrb.mxu0 %v2590_v58  ;;  %v2666_v58 = vor.u32 %v3810_v50, %v2665_v49  ;;  %v2762_v49 = vor.u32 %v3834_v41, %v2761_v39  ;;  %v2954_v50 = vor.u32 %v3882_v43, %v2953_v42  ;;  %v3849_v39 = vld [vmem:[%s6052_s1 + $0x254] sm:$0xf]  ;;  %v2835_v41 = vld [vmem:[%s6052_s1 + $0x268] sm:$0xf0] }
  0x79   :  { %1388 = vmatpush.bf16.msrb.mxu1 %v2782_v59  ;;  %v2858_v59 = vor.u32 %v3858_v53, %v2857_v51  ;;  %v2737_v51 = vld [vmem:[%s6052_s1 + $0x190] sm:$0xf]  ;;  %v3897_v42 = vld [vmem:[%s6052_s1 + $0x3d4] sm:$0xf]  ;;  %v3027_v43 = vld [vmem:[%s6052_s1 + $0x3e8] sm:$0xf0] }
  0x7a   :  { %1401 = vmatpush.bf16.msrb.mxu2 %v2974_v60  ;;  %v3050_v60 = vor.u32 %v3906_v55, %v3049_v54  ;;  %v2929_v53 = vld [vmem:[%s6052_s1 + $0x310] sm:$0xf]  ;;  %v3146_v54 = vor.u32 %v3930_v45, %v3145_v44  ;;  %v3876_v55 = vld [vmem:[%s6052_s1 + $0x324] sm:$0xf0]  ;;  %v3945_v44 = vld [vmem:[%s6052_s1 + $0x554] sm:$0xf] }
  0x7b   :  { %1414 = vmatpush.bf16.msrb.mxu3 %v3166_v0  ;;  %v3242_v0 = vor.u32 %v3954_v57, %v3241_v56  ;;  %v3121_v56 = vld [vmem:[%s6052_s1 + $0x490] sm:$0xf]  ;;  %v3924_v57 = vld [vmem:[%s6052_s1 + $0x4a4] sm:$0xf0]  ;;  %v2930_v2 = vor.u32 %v3876_v55, %v2929_v53  ;;  %v3219_v45 = vld [vmem:[%s6052_s1 + $0x568] sm:$0xf0] }
  0x7c   :  { %1376 = vmatpush.bf16.msrb.mxu0 %v2566_v6  ;;  %v2642_v6 = vor.u32 %v3804_v62, %v2641_v61  ;;  %v2907_v62 = vld [vmem:[%s6052_s1 + $0x2f8] sm:$0xf0]  ;;  %v3122_v5 = vor.u32 %v3924_v57, %v3121_v56  ;;  %v3939_v56 = vld [vmem:[%s6052_s1 + $0x524] sm:$0xf] }
  0x7d   :  { %1389 = vmatpush.bf16.msrb.mxu1 %v2758_v11  ;;  %v2617_v11 = vld [vmem:[%s6052_s1 + $0xa0] sm:$0xf]  ;;  %v2811_v53 = vld [vmem:[%s6052_s1 + $0x238] sm:$0xf0] }
  0x7e   :  { %1402 = vmatpush.bf16.msrb.mxu2 %v2950_v12  ;;  %v3798_v12 = vld [vmem:[%s6052_s1 + $0xb4] sm:$0xf0]  ;;  %v3003_v55 = vld [vmem:[%s6052_s1 + $0x3b8] sm:$0xf0] }
  0x7f   :  { %1415 = vmatpush.bf16.msrb.mxu3 %v3142_v17  ;;  %v3001_v17 = vld [vmem:[%s6052_s1 + $0x3a0] sm:$0xf]  ;;  %v2618_v22 = vor.u32 %v3798_v12, %v2617_v11  ;;  %v3813_v11 = vld [vmem:[%s6052_s1 + $0x134] sm:$0xf]  ;;  %v2691_v12 = vld [vmem:[%s6052_s1 + $0x148] sm:$0xf0] }
  0x80   :  { %1377 = vmatpush.bf16.msrb.mxu0 %v2542_v25  ;;  %v3002_v24 = vor.u32 %v3894_v18, %v3001_v17  ;;  %v2593_v25 = vld [vmem:[%s6052_s1 + $0x70] sm:$0xf]  ;;  %v3909_v17 = vld [vmem:[%s6052_s1 + $0x434] sm:$0xf]  ;;  %v3075_v18 = vld [vmem:[%s6052_s1 + $0x448] sm:$0xf0] }
  0x81   :  { %1390 = vmatpush.bf16.msrb.mxu1 %v2734_v29  ;;  %v3840_v29 = vld [vmem:[%s6052_s1 + $0x204] sm:$0xf0]  ;;  %v3195_v57 = vld [vmem:[%s6052_s1 + $0x538] sm:$0xf0] }
  0x82   :  { %1403 = vmatpush.bf16.msrb.mxu2 %v2926_v30  ;;  %v2977_v30 = vld [vmem:[%s6052_s1 + $0x370] sm:$0xf] }
  0x83   :  { %1416 = vmatpush.bf16.msrb.mxu3 %v3118_v33  ;;  %1378 = vmatmul.bf16.vlgmr.msrb.gmra.mxu0 %v4442_v14  ;;  %v3936_v33 = vld [vmem:[%s6052_s1 + $0x504] sm:$0xf0] }
  0x84   :  { %1422 = vmatpush.bf16.msra.mxu0 %v2714_v34  ;;  %1391 = vmatmul.bf16.vlgmr.msrb.gmra.mxu1 %v4454_v19  ;;  %v2594_v34 = vor.u32 %v3792_v26, %v2593_v25  ;;  %v3807_v25 = vld [vmem:[%s6052_s1 + $0x104] sm:$0xf]  ;;  %v2667_v26 = vld [vmem:[%s6052_s1 + $0x118] sm:$0xf0] }
  0x85   :  { %1435 = vmatpush.bf16.msra.mxu1 %v2906_v35  ;;  %1404 = vmatmul.bf16.vlgmr.msrb.gmra.mxu2 %v4429_v7  ;;  %v2786_v35 = vor.u32 %v3840_v29, %v2785_v27  ;;  %v3855_v27 = vld [vmem:[%s6052_s1 + $0x284] sm:$0xf]  ;;  %v2859_v29 = vld [vmem:[%s6052_s1 + $0x298] sm:$0xf0] }
  0x86   :  { %1448 = vmatpush.bf16.msra.mxu2 %v3098_v36  ;;  %1417 = vmatmul.bf16.vlgmr.msrb.gmra.mxu3 %v4431_v8  ;;  %v2978_v36 = vor.u32 %v3888_v31, %v2977_v30  ;;  %v3903_v30 = vld [vmem:[%s6052_s1 + $0x404] sm:$0xf]  ;;  %v3051_v31 = vld [vmem:[%s6052_s1 + $0x418] sm:$0xf0] }
  0x87   :  { %1461 = vmatpush.bf16.msra.mxu3 %v3290_v40  ;;  %v3170_v40 = vor.u32 %v3936_v33, %v3169_v32  ;;  %v3951_v32 = vld [vmem:[%s6052_s1 + $0x584] sm:$0xf]  ;;  %v3243_v33 = vld [vmem:[%s6052_s1 + $0x598] sm:$0xf0] }
  0x88   :  { %1423 = vmatpush.bf16.msra.mxu0 %v2690_v46  ;;  %v2570_v46 = vor.u32 %v3786_v38, %v2569_v37  ;;  %v3801_v37 = vld [vmem:[%s6052_s1 + $0xd4] sm:$0xf]  ;;  %v2643_v38 = vld [vmem:[%s6052_s1 + $0xe8] sm:$0xf0] }
  0x89   :  { %1436 = vmatpush.bf16.msra.mxu1 %v2882_v47  ;;  %v2545_v47 = vld [vmem:[%s6052_s1 + $0x10] sm:$0xf] }
  0x8a   :  { %1449 = vmatpush.bf16.msra.mxu2 %v3074_v48  ;;  %v3780_v48 = vld [vmem:[%s6052_s1 + $0x24] sm:$0xf0] }
  0x8b   :  { %1462 = vmatpush.bf16.msra.mxu3 %v3266_v52  ;;  %v3828_v52 = vld [vmem:[%s6052_s1 + $0x1a4] sm:$0xf0]  ;;  %v2546_v61 = vor.u32 %v3780_v48, %v2545_v47  ;;  %v2838_v47 = vor.u32 %v3849_v39, %v2835_v41  ;;  %v3030_v48 = vor.u32 %v3897_v42, %v3027_v43  ;;  %v3123_v39 = vld [vmem:[%s6052_s1 + $0x4a8] sm:$0xf0]  ;;  %v3982_v41 = vld [vmem:[%s6054_s3 + $0x74] sm:$0xf0] }
  0x8c   :  { %1424 = vmatpush.bf16.msra.mxu0 %v2666_v58  ;;  %v3819_v58 = vld [vmem:[%s6052_s1 + $0x164] sm:$0xf]  ;;  %v2738_v1 = vor.u32 %v3828_v52, %v2737_v51  ;;  %v3222_v52 = vor.u32 %v3945_v44, %v3219_v45  ;;  %v3417_v43 = vld [vmem:[%s6054_s3 + $0xf0] sm:$0xf]  ;;  %v3998_v44 = vld [vmem:[%s6054_s3 + $0xf4] sm:$0xf0] }
  0x8d   :  { %1437 = vmatpush.bf16.msra.mxu1 %v2858_v59  ;;  %v2715_v59 = vld [vmem:[%s6052_s1 + $0x178] sm:$0xf0]  ;;  %v3843_v51 = vld [vmem:[%s6052_s1 + $0x224] sm:$0xf] }
  0x8e   :  { %1450 = vmatpush.bf16.msra.mxu2 %v3050_v60  ;;  %v3867_v60 = vld [vmem:[%s6052_s1 + $0x2e4] sm:$0xf] }
  0x8f   :  { %1463 = vmatpush.bf16.msra.mxu3 %v3242_v0  ;;  %v3099_v0 = vld [vmem:[%s6052_s1 + $0x478] sm:$0xf0] }
  0x90   :  { %1425 = vmatpush.bf16.msra.mxu0 %v2642_v6  ;;  %v2718_v6 = vor.u32 %v3819_v58, %v2715_v59 }
  0x91   :  { %1438 = vmatpush.bf16.msra.mxu1 %v2834_v9  ;;  %v2910_v9 = vor.u32 %v3867_v60, %v2907_v62  ;;  %v2814_v60 = vor.u32 %v3843_v51, %v2811_v53  ;;  %v3789_v62 = vld [vmem:[%s6052_s1 + $0x74] sm:$0xf]  ;;  %v3481_v51 = vld [vmem:[%s6054_s3 + $0x170] sm:$0xf]  ;;  %v5374_v53 = vld [vmem:[%s6055_s2] sm:$0x3f] }
  0x92   :  { %1451 = vmatpush.bf16.msra.mxu2 %v3026_v10  ;;  %v3102_v10 = vor.u32 %v3915_v63, %v3099_v0  ;;  %v2595_v63 = vld [vmem:[%s6052_s1 + $0x88] sm:$0xf0]  ;;  %v3837_v0 = vld [vmem:[%s6052_s1 + $0x1f4] sm:$0xf] }
  0x93   :  { %1464 = vmatpush.bf16.msra.mxu3 %v3218_v15  ;;  %v3294_v15 = vor.u32 %v3963_v3, %v3291_v4  ;;  %v2787_v3 = vld [vmem:[%s6052_s1 + $0x208] sm:$0xf0]  ;;  %v3885_v4 = vld [vmem:[%s6052_s1 + $0x374] sm:$0xf] }
  0x94   :  { %1426 = vmatpush.bf16.msra.mxu0 %v2618_v22  ;;  %v2694_v22 = vor.u32 %v3813_v11, %v2691_v12  ;;  %v2790_v11 = vor.u32 %v3837_v0, %v2787_v3  ;;  %v4012_v0 = vld [vmem:[%s6054_s3 + $0x164] sm:$0xf0]  ;;  %v3337_v3 = vld [vmem:[%s6054_s3 + $0x50] sm:$0xf] }
  0x95   :  { %1439 = vmatpush.bf16.msra.mxu1 %v2810_v23  ;;  %v2886_v23 = vor.u32 %v3861_v13, %v2883_v16  ;;  %v3783_v13 = vld [vmem:[%s6052_s1 + $0x44] sm:$0xf] }
  0x96   :  { %1452 = vmatpush.bf16.msra.mxu2 %v3002_v24  ;;  %v3078_v24 = vor.u32 %v3909_v17, %v3075_v18  ;;  %v3831_v16 = vld [vmem:[%s6052_s1 + $0x1c4] sm:$0xf] }
  0x97   :  { %1465 = vmatpush.bf16.msra.mxu3 %v3194_v28  ;;  %v3270_v28 = vor.u32 %v3957_v20, %v3267_v21  ;;  %v2763_v20 = vld [vmem:[%s6052_s1 + $0x1d8] sm:$0xf0]  ;;  %v3879_v21 = vld [vmem:[%s6052_s1 + $0x344] sm:$0xf] }
  0x98   :  { %1427 = vmatpush.bf16.msra.mxu0 %v2594_v34  ;;  %v2670_v34 = vor.u32 %v3807_v25, %v2667_v26  ;;  %v3147_v25 = vld [vmem:[%s6052_s1 + $0x4d8] sm:$0xf0] }
  0x99   :  { %1440 = vmatpush.bf16.msra.mxu1 %v2786_v35  ;;  %v2862_v35 = vor.u32 %v3855_v27, %v2859_v29  ;;  %v3777_v27 = vld [vmem:[%s6052_s1 + $0x14] sm:$0xf]  ;;  %v2766_v29 = vor.u32 %v3831_v16, %v2763_v20 }
  0x9a   :  { %1453 = vmatpush.bf16.msra.mxu2 %v2978_v36  ;;  %v3054_v36 = vor.u32 %v3903_v30, %v3051_v31  ;;  %v2547_v31 = vld [vmem:[%s6052_s1 + $0x28] sm:$0xf0] }
  0x9b   :  { %1466 = vmatpush.bf16.msra.mxu3 %v3170_v40  ;;  %v3246_v40 = vor.u32 %v3951_v32, %v3243_v33  ;;  %v3825_v32 = vld [vmem:[%s6052_s1 + $0x194] sm:$0xf]  ;;  %v2739_v33 = vld [vmem:[%s6052_s1 + $0x1a8] sm:$0xf0]  ;;  %v2550_v42 = vor.u32 %v3777_v27, %v2547_v31  ;;  %v3321_v27 = vld [vmem:[%s6054_s3 + $0x30] sm:$0xf] }
  0x9c   :  { %1428 = vmatpush.bf16.msra.mxu0 %v2570_v46  ;;  %v2646_v46 = vor.u32 %v3801_v37, %v2643_v38  ;;  %v2931_v37 = vld [vmem:[%s6052_s1 + $0x328] sm:$0xf0]  ;;  %v3921_v38 = vld [vmem:[%s6052_s1 + $0x494] sm:$0xf]  ;;  %v2742_v45 = vor.u32 %v3825_v32, %v2739_v33  ;;  %v3990_v31 = vld [vmem:[%s6054_s3 + $0xb4] sm:$0xf0] }
  0x9d   :  { %1441 = vmatpush.bf16.msra.mxu1 %v2762_v49  ;;  %v3795_v49 = vld [vmem:[%s6052_s1 + $0xa4] sm:$0xf]  ;;  %v4030_v32 = vld [vmem:[%s6054_s3 + $0x1f4] sm:$0xf0] }
  0x9e   :  { %1454 = vmatpush.bf16.msra.mxu2 %v2954_v50  ;;  %v2619_v50 = vld [vmem:[%s6052_s1 + $0xb8] sm:$0xf0] }
  0x9f   :  { %1467 = vmatpush.bf16.msra.mxu3 %v3146_v54  ;;  %v3891_v54 = vld [vmem:[%s6052_s1 + $0x3a4] sm:$0xf]  ;;  %v2622_v58 = vor.u32 %v3795_v49, %v2619_v50 }
  0xa0   :  { %1429 = vmatpush.bf16.msra.mxu0 %v2546_v61  ;;  %v5273_v59 = vpop.f32.mrf.mxu0  ;;  %v3006_v61 = vor.u32 %v3891_v54, %v3003_v55  ;;  %v3418_v54 = vor.u32 %v3998_v44, %v3417_v43  ;;  %v3345_v55 = vld [vmem:[%s6054_s3 + $0x60] sm:$0xf] }
  0xa1   :  { %1442 = vmatpush.bf16.msra.mxu1 %v2738_v1  ;;  %v5284_v1 = vpop.f32.mrf.mxu1 }
  0xa2   :  { %1455 = vmatpush.bf16.msra.mxu2 %v2930_v2  ;;  %v3198_v2 = vor.u32 %v3939_v56, %v3195_v57  ;;  %v3980_v56 = vld [vmem:[%s6054_s3 + $0x64] sm:$0xf0]  ;;  %v3409_v57 = vld [vmem:[%s6054_s3 + $0xe0] sm:$0xf] }
  0xa3   :  { %1468 = vmatpush.bf16.msra.mxu3 %v3122_v5  ;;  %1430 = vmatmul.bf16.vlgmr.msra.gmra.mxu0 %v4442_v14  ;;  %v2979_v5 = vld [vmem:[%s6052_s1 + $0x388] sm:$0xf0] }
  0xa4   :  { %1474 = vmatpush.bf16.msrb.mxu0 %v2718_v6  ;;  %1443 = vmatmul.bf16.vlgmr.msra.gmra.mxu1 %v4454_v19  ;;  %v3933_v6 = vld [vmem:[%s6052_s1 + $0x4f4] sm:$0xf]  ;;  %v2982_v12 = vor.u32 %v3885_v4, %v2979_v5  ;;  %v3978_v4 = vld [vmem:[%s6054_s3 + $0x54] sm:$0xf0]  ;;  %v3401_v5 = vld [vmem:[%s6054_s3 + $0xd0] sm:$0xf] }
  0xa5   :  { %1487 = vmatpush.bf16.msrb.mxu1 %v2910_v9  ;;  %1456 = vmatmul.bf16.vlgmr.msra.gmra.mxu2 %v4429_v7  ;;  %v3171_v9 = vld [vmem:[%s6052_s1 + $0x508] sm:$0xf0] }
  0xa6   :  { %1500 = vmatpush.bf16.msrb.mxu2 %v3102_v10  ;;  %1469 = vmatmul.bf16.vlgmr.msra.gmra.mxu3 %v4431_v8  ;;  %v2598_v10 = vor.u32 %v3789_v62, %v2595_v63  ;;  %v3174_v18 = vor.u32 %v3933_v6, %v3171_v9  ;;  %v3346_v62 = vor.u32 %v3980_v56, %v3345_v55  ;;  %v3473_v63 = vld [vmem:[%s6054_s3 + $0x160] sm:$0xf]  ;;  %v4004_v56 = vld [vmem:[%s6054_s3 + $0x124] sm:$0xf0] }
  0xa7   :  { %1513 = vmatpush.bf16.msrb.mxu3 %v3294_v15  ;;  %v2571_v15 = vld [vmem:[%s6052_s1 + $0x58] sm:$0xf0]  ;;  %v3474_v6 = vor.u32 %v4012_v0, %v3473_v63  ;;  %v3441_v55 = vld [vmem:[%s6054_s3 + $0x120] sm:$0xf]  ;;  %v3986_v63 = vld [vmem:[%s6054_s3 + $0x94] sm:$0xf0] }
  0xa8   :  { %1475 = vmatpush.bf16.msrb.mxu0 %v2694_v22  ;;  %v5310_v17 = vpop.f32.mrf.mxu2  ;;  %v2955_v22 = vld [vmem:[%s6052_s1 + $0x358] sm:$0xf0]  ;;  %v2574_v26 = vor.u32 %v3783_v13, %v2571_v15  ;;  %v3393_v13 = vld [vmem:[%s6054_s3 + $0xc0] sm:$0xf]  ;;  %v3992_v15 = vld [vmem:[%s6054_s3 + $0xc4] sm:$0xf0]  ;;  %v3442_v0 = vor.u32 %v4004_v56, %v3441_v55 }
  0xa9   :  { %1488 = vmatpush.bf16.msrb.mxu1 %v2886_v23  ;;  %v5321_v23 = vpop.f32.mrf.mxu3  ;;  %v2958_v30 = vor.u32 %v3879_v21, %v2955_v22  ;;  %v3457_v22 = vld [vmem:[%s6054_s3 + $0x140] sm:$0xf]  ;;  %v3973_v55 = vld [vmem:[%s6054_s3 + $0x34] sm:$0xf] }
  0xaa   :  { %1501 = vmatpush.bf16.msrb.mxu2 %v3078_v24  ;;  %v3927_v24 = vld [vmem:[%s6052_s1 + $0x4c4] sm:$0xf] }
  0xab   :  { %1514 = vmatpush.bf16.msrb.mxu3 %v3270_v28  ;;  %v1225_v28 = vpop.f32.mrf.mxu0 }
  0xac   :  { %1476 = vmatpush.bf16.msrb.mxu0 %v2670_v34  ;;  %v1238_v34 = vpop.f32.mrf.mxu1 }
  0xad   :  { %1489 = vmatpush.bf16.msrb.mxu1 %v2862_v35  ;;  %v3150_v35 = vor.u32 %v3927_v24, %v3147_v25  ;;  %v4008_v24 = vld [vmem:[%s6054_s3 + $0x144] sm:$0xf0]  ;;  %v3394_v25 = vor.u32 %v3992_v15, %v3393_v13  ;;  %v3521_v13 = vld [vmem:[%s6054_s3 + $0x1c0] sm:$0xf] }
  0xae   :  { %1502 = vmatpush.bf16.msrb.mxu2 %v3054_v36  ;;  %v3873_v36 = vld [vmem:[%s6052_s1 + $0x314] sm:$0xf]  ;;  %v3458_v34 = vor.u32 %v4008_v24, %v3457_v22  ;;  %v4024_v15 = vld [vmem:[%s6054_s3 + $0x1c4] sm:$0xf0] }
  0xaf   :  { %1515 = vmatpush.bf16.msrb.mxu3 %v3246_v40  ;;  %v3353_v40 = vld [vmem:[%s6054_s3 + $0x70] sm:$0xf]  ;;  %v3522_v22 = vor.u32 %v4024_v15, %v3521_v13 }
  0xb0   :  { %1477 = vmatpush.bf16.msrb.mxu0 %v2646_v46  ;;  %v2934_v46 = vor.u32 %v3873_v36, %v2931_v37  ;;  %v3354_v49 = vor.u32 %v3982_v41, %v3353_v40 }
  0xb1   :  { %1490 = vmatpush.bf16.msrb.mxu1 %v2838_v47  ;;  %v1251_v47 = vpop.f32.mrf.mxu2  ;;  %v1264_v50 = vpop.f32.mrf.mxu3 }
  0xb2   :  { %1503 = vmatpush.bf16.msrb.mxu2 %v3030_v48  ;;  %v3126_v48 = vor.u32 %v3921_v38, %v3123_v39  ;;  %v3449_v38 = vld [vmem:[%s6054_s3 + $0x130] sm:$0xf]  ;;  %v4006_v39 = vld [vmem:[%s6054_s3 + $0x134] sm:$0xf0] }
  0xb3   :  { %1516 = vmatpush.bf16.msrb.mxu3 %v3222_v52  ;;  %v4014_v52 = vld [vmem:[%s6054_s3 + $0x174] sm:$0xf0]  ;;  %v3450_v47 = vor.u32 %v4006_v39, %v3449_v38  ;;  %v3497_v39 = vld [vmem:[%s6054_s3 + $0x190] sm:$0xf] }
  0xb4   :  { %1478 = vmatpush.bf16.msrb.mxu0 %v2622_v58  ;;  %v3996_v58 = vld [vmem:[%s6054_s3 + $0xe4] sm:$0xf0] }
  0xb5   :  { %1491 = vmatpush.bf16.msrb.mxu1 %v2814_v60  ;;  %v3482_v60 = vor.u32 %v4014_v52, %v3481_v51 }
  0xb6   :  { %1504 = vmatpush.bf16.msrb.mxu2 %v3006_v61  ;;  %v228_v61 = vperm.slane %v5374_v53, 0 }
  0xb7   :  { %1517 = vmatpush.bf16.msrb.mxu3 %v3198_v2  ;;  %v3410_v2 = vor.u32 %v3996_v58, %v3409_v57 }
  0xb8   :  { %1479 = vmatpush.bf16.msrb.mxu0 %v2598_v10  ;;  %v1224_v9 = vadd.f32 %v5273_v59, %v228_v61  ;;  %v3338_v10 = vor.u32 %v3978_v4, %v3337_v3  ;;  %v3976_v59 = vld [vmem:[%s6054_s3 + $0x44] sm:$0xf0]  ;;  %v4026_v3 = vld [vmem:[%s6054_s3 + $0x1d4] sm:$0xf0] }
  0xb9   :  { %1492 = vmatpush.bf16.msrb.mxu1 %v2790_v11 }
  0xba   :  { %1505 = vmatpush.bf16.msrb.mxu2 %v2982_v12  ;;  %v229_v12 = vperm.slane %v5374_v53, 1 }
  0xbb   :  { %1518 = vmatpush.bf16.msrb.mxu3 %v3174_v18  ;;  %v1237_v18 = vadd.f32 %v5284_v1, %v1224_v9  ;;  %v3974_v1 = vld [vmem:[%s6054_s3 + $0x34] sm:$0xf0] }
  0xbc   :  { %1480 = vmatpush.bf16.msrb.mxu0 %v2574_v26  ;;  %v3322_v37 = vor.u32 %v3974_v1, %v3321_v27  ;;  %v3513_v27 = vld [vmem:[%s6054_s3 + $0x1b0] sm:$0xf]  ;;  %v4022_v1 = vld [vmem:[%s6054_s3 + $0x1b4] sm:$0xf0] }
  0xbd   :  { %1493 = vmatpush.bf16.msrb.mxu1 %v2766_v29  ;;  %v3545_v29 = vld [vmem:[%s6054_s3 + $0x1f0] sm:$0xf]  ;;  %v1250_v36 = vadd.f32 %v5310_v17, %v1237_v18  ;;  %v3972_v17 = vld [vmem:[%s6054_s3 + $0x24] sm:$0xf0]  ;;  %v3425_v18 = vld [vmem:[%s6054_s3 + $0x100] sm:$0xf] }
  0xbe   :  { %1506 = vmatpush.bf16.msrb.mxu2 %v2958_v30  ;;  %v3385_v30 = vld [vmem:[%s6054_s3 + $0xb0] sm:$0xf] }
  0xbf   :  { %1519 = vmatpush.bf16.msrb.mxu3 %v3150_v35  ;;  %v3546_v35 = vor.u32 %v4030_v32, %v3545_v29  ;;  %v3386_v40 = vor.u32 %v3990_v31, %v3385_v30  ;;  %v1263_v50 = vadd.f32 %v5321_v23, %v1250_v36  ;;  %v3970_v23 = vld [vmem:[%s6054_s3 + $0x14] sm:$0xf0]  ;;  %v3514_v29 = vor.u32 %v4022_v1, %v3513_v27  ;;  %v3505_v31 = vld [vmem:[%s6054_s3 + $0x1a0] sm:$0xf]  ;;  %v4020_v32 = vld [vmem:[%s6054_s3 + $0x1a4] sm:$0xf0] }
  0xc0   :  { %1481 = vmatpush.bf16.msrb.mxu0 %v2550_v42  ;;  %v1275_v21 = vpop.f32.mrf.mxu0  ;;  %v3313_v42 = vld [vmem:[%s6054_s3 + $0x20] sm:$0xf]  ;;  %v3979_v36 = vld [vmem:[%s6054_s3 + $0x64] sm:$0xf]  ;;  %v3506_v38 = vor.u32 %v4020_v32, %v3505_v31 }
  0xc1   :  { %1494 = vmatpush.bf16.msrb.mxu1 %v2742_v45  ;;  %v1276_v26 = vadd.f32 %v1275_v21, %v229_v12  ;;  %v1288_v28 = vpop.f32.mrf.mxu1  ;;  %v3377_v45 = vld [vmem:[%s6054_s3 + $0xa0] sm:$0xf]  ;;  %v3314_v51 = vor.u32 %v3972_v17, %v3313_v42  ;;  %v3981_v21 = vld [vmem:[%s6054_s3 + $0x74] sm:$0xf]  ;;  %v3339_v17 = vld [vmem:[%s6054_s3 + $0x58] sm:$0xf0] }
  0xc2   :  { %1507 = vmatpush.bf16.msrb.mxu2 %v2934_v46  ;;  %v3988_v46 = vld [vmem:[%s6054_s3 + $0xa4] sm:$0xf0]  ;;  %v3977_v42 = vld [vmem:[%s6054_s3 + $0x54] sm:$0xf]  ;;  %v3991_v31 = vld [vmem:[%s6054_s3 + $0xc4] sm:$0xf] }
  0xc3   :  { %1520 = vmatpush.bf16.msrb.mxu3 %v3126_v48  ;;  %1482 = vmatmul.bf16.vlgmr.msrb.gmra.mxu0 %v4442_v14  ;;  %v3994_v14 = vld [vmem:[%s6054_s3 + $0xd4] sm:$0xf0]  ;;  %v1289_v33 = vadd.f32 %v1288_v28, %v1276_v26  ;;  %v3537_v48 = vld [vmem:[%s6054_s3 + $0x1e0] sm:$0xf]  ;;  %v3378_v58 = vor.u32 %v3988_v46, %v3377_v45  ;;  %v3355_v26 = vld [vmem:[%s6054_s3 + $0x78] sm:$0xf0]  ;;  %v3342_v45 = vor.u32 %v3977_v42, %v3339_v17 }
  0xc4   :  { %2120 = vmatpush.bf16.msra.mxu0 %v3354_v49  ;;  %1495 = vmatmul.bf16.vlgmr.msrb.gmra.mxu1 %v4454_v19  ;;  %v4010_v19 = vld [vmem:[%s6054_s3 + $0x154] sm:$0xf0]  ;;  %v3402_v11 = vor.u32 %v3994_v14, %v3401_v5  ;;  %v4028_v49 = vld [vmem:[%s6054_s3 + $0x1e4] sm:$0xf0]  ;;  %v3433_v5 = vld [vmem:[%s6054_s3 + $0x110] sm:$0xf] }
  0xc5   :  { %2133 = vmatpush.bf16.msra.mxu1 %v3418_v54  ;;  %1508 = vmatmul.bf16.vlgmr.msrb.gmra.mxu2 %v4429_v7  ;;  %v3465_v7 = vld [vmem:[%s6054_s3 + $0x150] sm:$0xf]  ;;  %v3538_v57 = vor.u32 %v4028_v49, %v3537_v48  ;;  %v4002_v14 = vld [vmem:[%s6054_s3 + $0x114] sm:$0xf0]  ;;  %v3975_v46 = vld [vmem:[%s6054_s3 + $0x44] sm:$0xf] }
  0xc6   :  { %1521 = vmatmul.bf16.vlgmr.msrb.gmra.mxu3 %v4431_v8  ;;  %2146 = vmatpush.bf16.msra.mxu2 %v3482_v60  ;;  %v3329_v8 = vld [vmem:[%s6054_s3 + $0x40] sm:$0xf]  ;;  %v3466_v16 = vor.u32 %v4010_v19, %v3465_v7  ;;  %v3305_v60 = vld [vmem:[%s6054_s3 + $0x10] sm:$0xf]  ;;  %v3968_v7 = vld [vmem:[%s6054_s3 + $0x4] sm:$0xf0]  ;;  %v3434_v12 = vor.u32 %v4002_v14, %v3433_v5 }
  0xc7   :  { %v3330_v20 = vor.u32 %v3976_v59, %v3329_v8  ;;  %2159 = vmatpush.bf16.msra.mxu3 %v3546_v35  ;;  %v3306_v4 = vor.u32 %v3970_v23, %v3305_v60  ;;  %v3984_v8 = vld [vmem:[%s6054_s3 + $0x84] sm:$0xf0]  ;;  %v3323_v23 = vld [vmem:[%s6054_s3 + $0x38] sm:$0xf0]  ;;  %v3601_v14 = vld [vmem:[%s6054_s3 + $0x260] sm:$0xf] }
  0xc8   :  { %2121 = vmatpush.bf16.msra.mxu0 %v3346_v62  ;;  %v1301_v41 = vpop.f32.mrf.mxu2  ;;  %v1277_v54 = vpop.f32.mrf.mxu0  ;;  %v3369_v62 = vld [vmem:[%s6054_s3 + $0x90] sm:$0xf]  ;;  %v3326_v5 = vor.u32 %v3973_v55, %v3323_v23  ;;  %v3967_v32 = vld [vmem:[%s6054_s3 + $0x4] sm:$0xf]  ;;  %v4038_v42 = vld [vmem:[%s6054_s3 + $0x234] sm:$0xf0] }
  0xc9   :  { %2134 = vmatpush.bf16.msra.mxu1 %v3410_v2  ;;  %v1302_v43 = vadd.f32 %v1301_v41, %v1289_v33  ;;  %v1314_v44 = vpop.f32.mrf.mxu3  ;;  %v1290_v61 = vpop.f32.mrf.mxu1  ;;  %v3529_v2 = vld [vmem:[%s6054_s3 + $0x1d0] sm:$0xf]  ;;  %v3370_v9 = vor.u32 %v3986_v63, %v3369_v62  ;;  %v3997_v62 = vld [vmem:[%s6054_s3 + $0xf4] sm:$0xf]  ;;  %v3419_v63 = vld [vmem:[%s6054_s3 + $0xf8] sm:$0xf0] }
  0xca   :  { %2147 = vmatpush.bf16.msra.mxu2 %v3474_v6  ;;  %v3530_v6 = vor.u32 %v4026_v3, %v3529_v2  ;;  %v3989_v17 = vld [vmem:[%s6054_s3 + $0xb4] sm:$0xf]  ;;  %v4043_v55 = vld [vmem:[%s6054_s3 + $0x264] sm:$0xf]  ;;  %v4034_v23 = vld [vmem:[%s6054_s3 + $0x214] sm:$0xf0] }
  0xcb   :  { %v1315_v52 = vadd.f32 %v1314_v44, %v1302_v43  ;;  %2160 = vmatpush.bf16.msra.mxu3 %v3538_v57  ;;  %v230_v44 = vperm.slane %v5374_v53, 2  ;;  %v3609_v57 = vld [vmem:[%s6054_s3 + $0x270] sm:$0xf] }
  0xcc   :  { %2122 = vmatpush.bf16.msra.mxu0 %v3338_v10  ;;  %v3297_v10 = vld [vmem:[%s6054_s3] sm:$0xf] }
  0xcd   :  { %2135 = vmatpush.bf16.msra.mxu1 %v3402_v11  ;;  %4089 = vtanh.f32 %v1315_v52  ;;  %v3361_v11 = vld [vmem:[%s6054_s3 + $0x80] sm:$0xf]  ;;  %v4016_v52 = vld [vmem:[%s6054_s3 + $0x184] sm:$0xf0] }
  0xce   :  { %2148 = vmatpush.bf16.msra.mxu2 %v3466_v16  ;;  %4091 = vtanh.f32 %v1263_v50  ;;  %v3298_v16 = vor.u32 %v3968_v7, %v3297_v10  ;;  %v3971_v10 = vld [vmem:[%s6054_s3 + $0x24] sm:$0xf]  ;;  %v3315_v7 = vld [vmem:[%s6054_s3 + $0x28] sm:$0xf0] }
  0xcf   :  { %2161 = vmatpush.bf16.msra.mxu3 %v3530_v6  ;;  %v4044_v6 = vld [vmem:[%s6054_s3 + $0x264] sm:$0xf0]  ;;  %v3318_v15 = vor.u32 %v3971_v10, %v3315_v7  ;;  %v3983_v7 = vld [vmem:[%s6054_s3 + $0x84] sm:$0xf] }
  0xd0   :  { %2123 = vmatpush.bf16.msra.mxu0 %v3330_v20  ;;  %v1303_v19 = vpop.f32.mrf.mxu2  ;;  %v4000_v20 = vld [vmem:[%s6054_s3 + $0x104] sm:$0xf0] }
  0xd1   :  { %2136 = vmatpush.bf16.msra.mxu1 %v3394_v25  ;;  %v1316_v59 = vpop.f32.mrf.mxu3  ;;  %v3362_v25 = vor.u32 %v3984_v8, %v3361_v11  ;;  %v3426_v30 = vor.u32 %v4000_v20, %v3425_v18  ;;  %v3602_v19 = vor.u32 %v4044_v6, %v3601_v14  ;;  %v3411_v11 = vld [vmem:[%s6054_s3 + $0xe8] sm:$0xf0]  ;;  %v4042_v18 = vld [vmem:[%s6054_s3 + $0x254] sm:$0xf0]  ;;  %v3993_v20 = vld [vmem:[%s6054_s3 + $0xd4] sm:$0xf] }
  0xd2   :  { %2149 = vmatpush.bf16.msra.mxu2 %v3458_v34  ;;  %v3358_v34 = vor.u32 %v3981_v21, %v3355_v26  ;;  %v3969_v21 = vld [vmem:[%s6054_s3 + $0x14] sm:$0xf]  ;;  %v4032_v10 = vld [vmem:[%s6054_s3 + $0x204] sm:$0xf0] }
  0xd3   :  { %v4090_v24 = vpop.eup %4089  ;;  %2162 = vmatpush.bf16.msra.mxu3 %v3522_v22  ;;  %v3307_v22 = vld [vmem:[%s6054_s3 + $0x18] sm:$0xf0] }
  0xd4   :  { %2124 = vmatpush.bf16.msra.mxu0 %v3322_v37  ;;  %v4092_v28 = vpop.eup %4091  ;;  %v5554_v33 = vpack.c.bf16 %v4090_v24, %v4090_v24  ;;  %v3347_v37 = vld [vmem:[%s6054_s3 + $0x68] sm:$0xf0] }
  0xd5   :  { %2137 = vmatpush.bf16.msra.mxu1 %v3386_v40  ;;  %v5556_v35 = vpack.c.bf16 %v4092_v28, %v4092_v28  ;;  %v4018_v40 = vld [vmem:[%s6054_s3 + $0x194] sm:$0xf0]  ;;  %v3350_v41 = vor.u32 %v3979_v36, %v3347_v37  ;;  %v3310_v28 = vor.u32 %v3969_v21, %v3307_v22  ;;  %v3395_v37 = vld [vmem:[%s6054_s3 + $0xc8] sm:$0xf0]  ;;  %v4039_v21 = vld [vmem:[%s6054_s3 + $0x244] sm:$0xf] }
  0xd6   :  { %2150 = vmatpush.bf16.msra.mxu2 %v3450_v47  ;;  %v3498_v43 = vor.u32 %v4018_v40, %v3497_v39  ;;  %v3331_v47 = vld [vmem:[%s6054_s3 + $0x48] sm:$0xf0]  ;;  %v3398_v39 = vor.u32 %v3991_v31, %v3395_v37 }
  0xd7   :  { %2163 = vmatpush.bf16.msra.mxu3 %v3514_v29  ;;  %v3334_v54 = vor.u32 %v3975_v46, %v3331_v47  ;;  %v3585_v29 = vld [vmem:[%s6054_s3 + $0x240] sm:$0xf]  ;;  %v4045_v46 = vld [vmem:[%s6054_s3 + $0x274] sm:$0xf]  ;;  %v3611_v47 = vld [vmem:[%s6054_s3 + $0x278] sm:$0xf0] }
  0xd8   :  { %2125 = vmatpush.bf16.msra.mxu0 %v3314_v51  ;;  %v3489_v51 = vld [vmem:[%s6054_s3 + $0x180] sm:$0xf] }
  0xd9   :  { %2138 = vmatpush.bf16.msra.mxu1 %v3378_v58  ;;  %v3490_v56 = vor.u32 %v4016_v52, %v3489_v51  ;;  %v4046_v58 = vld [vmem:[%s6054_s3 + $0x274] sm:$0xf0]  ;;  %v4036_v51 = vld [vmem:[%s6054_s3 + $0x224] sm:$0xf0]  ;;  %v3987_v52 = vld [vmem:[%s6054_s3 + $0xa4] sm:$0xf] }
  0xda   :  { %2151 = vmatpush.bf16.msra.mxu2 %v3442_v0  ;;  %v3610_v61 = vor.u32 %v4046_v58, %v3609_v57  ;;  %v3422_v0 = vor.u32 %v3997_v62, %v3419_v63  ;;  %v3985_v62 = vld [vmem:[%s6054_s3 + $0x94] sm:$0xf]  ;;  %v3371_v63 = vld [vmem:[%s6054_s3 + $0x98] sm:$0xf0] }
  0xdb   :  { %2164 = vmatpush.bf16.msra.mxu3 %v3506_v38 }
  0xdc   :  { %2126 = vmatpush.bf16.msra.mxu0 %v3306_v4 }
  0xdd   :  { %2139 = vmatpush.bf16.msra.mxu1 %v3370_v9  ;;  %v3995_v9 = vld [vmem:[%s6054_s3 + $0xe4] sm:$0xf] }
  0xde   :  { %2152 = vmatpush.bf16.msra.mxu2 %v3434_v12  ;;  %v3414_v12 = vor.u32 %v3995_v9, %v3411_v11  ;;  %v3553_v9 = vld [vmem:[%s6054_s3 + $0x200] sm:$0xf] }
  0xdf   :  { %2165 = vmatpush.bf16.msra.mxu3 %v3498_v43 }
  0xe0   :  { %2127 = vmatpush.bf16.msra.mxu0 %v3298_v16  ;;  %v1327_v48 = vpop.f32.mrf.mxu0  ;;  %v3593_v16 = vld [vmem:[%s6054_s3 + $0x250] sm:$0xf] }
  0xe1   :  { %2140 = vmatpush.bf16.msra.mxu1 %v3362_v25  ;;  %v1328_v49 = vadd.f32 %v1327_v48, %v230_v44  ;;  %v1340_v50 = vpop.f32.mrf.mxu1  ;;  %v3594_v24 = vor.u32 %v4042_v18, %v3593_v16  ;;  %v3403_v25 = vld [vmem:[%s6054_s3 + $0xd8] sm:$0xf0]  ;;  %v4013_v18 = vld [vmem:[%s6054_s3 + $0x174] sm:$0xf] }
  0xe2   :  { %2153 = vmatpush.bf16.msra.mxu2 %v3426_v30  ;;  %v3406_v26 = vor.u32 %v3993_v20, %v3403_v25  ;;  %v4040_v30 = vld [vmem:[%s6054_s3 + $0x244] sm:$0xf0]  ;;  %v3483_v20 = vld [vmem:[%s6054_s3 + $0x178] sm:$0xf0]  ;;  %v3587_v25 = vld [vmem:[%s6054_s3 + $0x248] sm:$0xf0] }
  0xe3   :  { %2128 = vmatmul.bf16.vlgmr.msra.gmra.mxu0 %v5556_v35  ;;  %v1341_v60 = vadd.f32 %v1340_v50, %v1328_v49  ;;  %2166 = vmatpush.bf16.msra.mxu3 %v3490_v56  ;;  %v3586_v36 = vor.u32 %v4040_v30, %v3585_v29  ;;  %v3614_v49 = vor.u32 %v4045_v46, %v3611_v47  ;;  %v3569_v50 = vld [vmem:[%s6054_s3 + $0x220] sm:$0xf]  ;;  %v3603_v56 = vld [vmem:[%s6054_s3 + $0x268] sm:$0xf0]  ;;  %v4011_v29 = vld [vmem:[%s6054_s3 + $0x164] sm:$0xf] }
  0xe4   :  { %2141 = vmatmul.bf16.vlgmr.msra.gmra.mxu1 %v5554_v33  ;;  %2172 = vmatpush.bf16.msrb.mxu0 %v3610_v61  ;;  %v3570_v57 = vor.u32 %v4036_v51, %v3569_v50  ;;  %v3606_v61 = vor.u32 %v4043_v55, %v3603_v56  ;;  %v3467_v46 = vld [vmem:[%s6054_s3 + $0x158] sm:$0xf0]  ;;  %v4035_v47 = vld [vmem:[%s6054_s3 + $0x224] sm:$0xf] }
  0xe5   :  { %v4007_v55 = vld [vmem:[%s6054_s3 + $0x144] sm:$0xf] }
  0xe6   :  { %2198 = vmatpush.bf16.msrb.mxu2 %v3358_v34  ;;  %v3299_v34 = vld [vmem:[%s6054_s3 + $0x8] sm:$0xf0] }
  0xe7   :  { %2211 = vmatpush.bf16.msrb.mxu3 %v3422_v0  ;;  %v3302_v43 = vor.u32 %v3967_v32, %v3299_v34  ;;  %v4037_v34 = vld [vmem:[%s6054_s3 + $0x234] sm:$0xf] }
  0xe8   :  { %v1353_v2 = vpop.f32.mrf.mxu2  ;;  %v1329_v59 = vpop.f32.mrf.mxu0  ;;  %2173 = vmatpush.bf16.msrb.mxu0 %v3602_v19 }
  0xe9   :  { %v1354_v3 = vadd.f32 %v1353_v2, %v1341_v60  ;;  %v1366_v4 = vpop.f32.mrf.mxu3  ;;  %v1342_v13 = vpop.f32.mrf.mxu1  ;;  %v3561_v60 = vld [vmem:[%s6054_s3 + $0x210] sm:$0xf]  ;;  %v3374_v2 = vor.u32 %v3985_v62, %v3371_v63  ;;  %v3363_v59 = vld [vmem:[%s6054_s3 + $0x88] sm:$0xf0]  ;;  %v4061_v63 = vld [vmem:[%s6054_s3 + $0x2f4] sm:$0xf] }
  0xea   :  { %2199 = vmatpush.bf16.msrb.mxu2 %v3350_v41  ;;  %v3577_v41 = vld [vmem:[%s6054_s3 + $0x230] sm:$0xf]  ;;  %v3562_v0 = vor.u32 %v4034_v23, %v3561_v60  ;;  %v4062_v13 = vld [vmem:[%s6054_s3 + $0x2f4] sm:$0xf0]  ;;  %v4033_v60 = vld [vmem:[%s6054_s3 + $0x214] sm:$0xf] }
  0xeb   :  { %v1367_v8 = vadd.f32 %v1366_v4, %v1354_v3  ;;  %2212 = vmatpush.bf16.msrb.mxu3 %v3414_v12  ;;  %v3578_v44 = vor.u32 %v4038_v42, %v3577_v41  ;;  %v231_v3 = vperm.slane %v5374_v53, 3  ;;  %v4041_v4 = vld [vmem:[%s6054_s3 + $0x254] sm:$0xf]  ;;  %v3673_v12 = vld [vmem:[%s6054_s3 + $0x2f0] sm:$0xf] }
  0xec   :  { %2174 = vmatpush.bf16.msrb.mxu0 %v3594_v24  ;;  %v3674_v16 = vor.u32 %v4062_v13, %v3673_v12  ;;  %v3486_v24 = vor.u32 %v4013_v18, %v3483_v20  ;;  %v3563_v23 = vld [vmem:[%s6054_s3 + $0x218] sm:$0xf0]  ;;  %v3667_v12 = vld [vmem:[%s6054_s3 + $0x2e8] sm:$0xf0]  ;;  %v3633_v13 = vld [vmem:[%s6054_s3 + $0x2a0] sm:$0xf] }
  0xed   :  { %4093 = vtanh.f32 %v1367_v8  ;;  %v3554_v8 = vor.u32 %v4032_v10, %v3553_v9  ;;  %v3566_v62 = vor.u32 %v4033_v60, %v3563_v23  ;;  %v3451_v10 = vld [vmem:[%s6054_s3 + $0x138] sm:$0xf0]  ;;  %v4003_v18 = vld [vmem:[%s6054_s3 + $0x124] sm:$0xf]  ;;  %v3443_v20 = vld [vmem:[%s6054_s3 + $0x128] sm:$0xf0] }
  0xee   :  { %2200 = vmatpush.bf16.msrb.mxu2 %v3342_v45  ;;  %v3387_v45 = vld [vmem:[%s6054_s3 + $0xb8] sm:$0xf0]  ;;  %2185 = vmatpush.bf16.msrb.mxu1 %v3674_v16  ;;  %v4052_v16 = vld [vmem:[%s6054_s3 + $0x2a4] sm:$0xf0]  ;;  %v3635_v60 = vld [vmem:[%s6054_s3 + $0x2a8] sm:$0xf0] }
  0xef   :  { %2213 = vmatpush.bf16.msrb.mxu3 %v3406_v26  ;;  %v3390_v48 = vor.u32 %v3989_v17, %v3387_v45  ;;  %v3590_v26 = vor.u32 %v4039_v21, %v3587_v25  ;;  %v3657_v17 = vld [vmem:[%s6054_s3 + $0x2d0] sm:$0xf]  ;;  %v3634_v21 = vor.u32 %v4052_v16, %v3633_v13  ;;  %v3659_v25 = vld [vmem:[%s6054_s3 + $0x2d8] sm:$0xf0]  ;;  %v4021_v16 = vld [vmem:[%s6054_s3 + $0x1b4] sm:$0xf] }
  0xf0   :  { %v1355_v27 = vpop.f32.mrf.mxu2  ;;  %2175 = vmatpush.bf16.msrb.mxu0 %v3586_v36  ;;  %v3579_v36 = vld [vmem:[%s6054_s3 + $0x238] sm:$0xf0] }
  0xf1   :  { %v1368_v1 = vpop.f32.mrf.mxu3 }
  0xf2   :  { %2201 = vmatpush.bf16.msrb.mxu2 %v3334_v54  ;;  %v3379_v54 = vld [vmem:[%s6054_s3 + $0xa8] sm:$0xf0]  ;;  %v3665_v1 = vld [vmem:[%s6054_s3 + $0x2e0] sm:$0xf] }
  0xf3   :  { %v4094_v38 = vpop.eup %4093  ;;  %2214 = vmatpush.bf16.msrb.mxu3 %v3398_v39  ;;  %v3382_v58 = vor.u32 %v3987_v52, %v3379_v54  ;;  %v3649_v52 = vld [vmem:[%s6054_s3 + $0x2c0] sm:$0xf]  ;;  %v4056_v54 = vld [vmem:[%s6054_s3 + $0x2c4] sm:$0xf0] }
  0xf4   :  { %v5663_v40 = vpack.c.bf16 %v4094_v38, %v4094_v38  ;;  %2176 = vmatpush.bf16.msrb.mxu0 %v3578_v44  ;;  %v3582_v38 = vor.u32 %v4037_v34, %v3579_v36  ;;  %v4009_v44 = vld [vmem:[%s6054_s3 + $0x154] sm:$0xf] }
  0xf6   :  { %2202 = vmatpush.bf16.msrb.mxu2 %v3326_v5  ;;  %v3595_v5 = vld [vmem:[%s6054_s3 + $0x258] sm:$0xf0] }
  0xf7   :  { %2154 = vmatmul.bf16.vlgmr.msra.gmra.mxu2 %v5663_v40  ;;  %2215 = vmatpush.bf16.msrb.mxu3 %v3390_v48  ;;  %v3598_v14 = vor.u32 %v4041_v4, %v3595_v5  ;;  %v3571_v48 = vld [vmem:[%s6054_s3 + $0x228] sm:$0xf0]  ;;  %v3641_v5 = vld [vmem:[%s6054_s3 + $0x2b0] sm:$0xf] }
  0xf8   :  { %2177 = vmatpush.bf16.msrb.mxu0 %v3570_v57  ;;  %v3574_v50 = vor.u32 %v4035_v47, %v3571_v48  ;;  %v3650_v57 = vor.u32 %v4056_v54, %v3649_v52  ;;  %v4027_v54 = vld [vmem:[%s6054_s3 + $0x1e4] sm:$0xf] }
  0xfa   :  { %2203 = vmatpush.bf16.msrb.mxu2 %v3318_v15  ;;  %v3366_v15 = vor.u32 %v3983_v7, %v3363_v59  ;;  %v4031_v7 = vld [vmem:[%s6054_s3 + $0x204] sm:$0xf] }
  0xfb   :  { %2216 = vmatpush.bf16.msrb.mxu3 %v3382_v58  ;;  %v3459_v58 = vld [vmem:[%s6054_s3 + $0x148] sm:$0xf0]  ;;  %v4059_v59 = vld [vmem:[%s6054_s3 + $0x2e4] sm:$0xf] }
  0xfc   :  { %2178 = vmatpush.bf16.msrb.mxu0 %v3562_v0  ;;  %v3675_v0 = vld [vmem:[%s6054_s3 + $0x2f8] sm:$0xf0] }
  0xfe   :  { %2204 = vmatpush.bf16.msrb.mxu2 %v3310_v28  ;;  %v4060_v28 = vld [vmem:[%s6054_s3 + $0x2e4] sm:$0xf0] }
  0xff   :  { %2217 = vmatpush.bf16.msrb.mxu3 %v3374_v2  ;;  %v3666_v32 = vor.u32 %v4060_v28, %v3665_v1  ;;  %v4050_v1 = vld [vmem:[%s6054_s3 + $0x294] sm:$0xf0]  ;;  %v4001_v28 = vld [vmem:[%s6054_s3 + $0x114] sm:$0xf] }
 0x100   :  { %v1379_v6 = vpop.f32.mrf.mxu0  ;;  %2179 = vmatpush.bf16.msrb.mxu0 %v3554_v8 }
 0x101   :  { %v1380_v19 = vadd.f32 %v1379_v6, %v231_v3  ;;  %v1392_v11 = vpop.f32.mrf.mxu1  ;;  %2186 = vmatpush.bf16.msrb.mxu1 %v3666_v32  ;;  %v3678_v3 = vor.u32 %v4061_v63, %v3675_v0  ;;  %v4005_v6 = vld [vmem:[%s6054_s3 + $0x134] sm:$0xf]  ;;  %v3651_v32 = vld [vmem:[%s6054_s3 + $0x2c8] sm:$0xf0] }
 0x102   :  { %2205 = vmatpush.bf16.msrb.mxu2 %v3302_v43  ;;  %v4058_v43 = vld [vmem:[%s6054_s3 + $0x2d4] sm:$0xf0] }
 0x103   :  { %v1393_v22 = vadd.f32 %v1392_v11, %v1380_v19  ;;  %2218 = vmatpush.bf16.msrb.mxu3 %v3366_v15  ;;  %v3658_v45 = vor.u32 %v4058_v43, %v3657_v17  ;;  %v3555_v19 = vld [vmem:[%s6054_s3 + $0x208] sm:$0xf0]  ;;  %v3454_v11 = vor.u32 %v4005_v6, %v3451_v10  ;;  %v3670_v15 = vor.u32 %v4059_v59, %v3667_v12  ;;  %v4029_v43 = vld [vmem:[%s6054_s3 + $0x1f4] sm:$0xf]  ;;  %v3627_v6 = vld [vmem:[%s6054_s3 + $0x298] sm:$0xf0] }
 0x104   :  { %2224 = vmatpush.bf16.msra.mxu0 %v3486_v24  ;;  %v3558_v8 = vor.u32 %v4031_v7, %v3555_v19  ;;  %v4057_v24 = vld [vmem:[%s6054_s3 + $0x2d4] sm:$0xf]  ;;  %v3427_v17 = vld [vmem:[%s6054_s3 + $0x108] sm:$0xf0]  ;;  %v4023_v10 = vld [vmem:[%s6054_s3 + $0x1c4] sm:$0xf] }
 0x105   :  { %2187 = vmatpush.bf16.msrb.mxu1 %v3658_v45  ;;  %v3523_v7 = vld [vmem:[%s6054_s3 + $0x1c8] sm:$0xf0]  ;;  %v4047_v19 = vld [vmem:[%s6054_s3 + $0x284] sm:$0xf] }
 0x106   :  { %2250 = vmatpush.bf16.msra.mxu2 %v3614_v49  ;;  %v3470_v49 = vor.u32 %v4009_v44, %v3467_v46  ;;  %v3547_v44 = vld [vmem:[%s6054_s3 + $0x1f8] sm:$0xf0]  ;;  %v3619_v59 = vld [vmem:[%s6054_s3 + $0x288] sm:$0xf0] }
 0x107   :  { %2206 = vmatmul.bf16.vlgmr.msrb.gmra.mxu2 %v5556_v35  ;;  %v3475_v35 = vld [vmem:[%s6054_s3 + $0x168] sm:$0xf0]  ;;  %v3550_v48 = vor.u32 %v4029_v43, %v3547_v44  ;;  %v3622_v13 = vor.u32 %v4047_v19, %v3619_v59 }
 0x108   :  { %v1405_v27 = vpop.f32.mrf.mxu2  ;;  %v3478_v37 = vor.u32 %v4011_v29, %v3475_v35  ;;  %v1381_v41 = vpop.f32.mrf.mxu0  ;;  %v232_v35 = vperm.slane %v5374_v53, 4  ;;  %v4076_v19 = vld [vmem:[%s6058_s5 + $0x68] sm:$0xff] }
 0x109   :  { %v1406_v30 = vadd.f32 %v1405_v27, %v1393_v22  ;;  %v1418_v31 = vpop.f32.mrf.mxu3  ;;  %v1394_v42 = vpop.f32.mrf.mxu1  ;;  %2188 = vmatpush.bf16.msrb.mxu1 %v3650_v57  ;;  %v3446_v22 = vor.u32 %v4003_v18, %v3443_v20  ;;  %v3625_v27 = vld [vmem:[%s6054_s3 + $0x290] sm:$0xf]  ;;  %v3515_v18 = vld [vmem:[%s6054_s3 + $0x1b8] sm:$0xf0] }
 0x10a   :  { %2251 = vmatpush.bf16.msra.mxu2 %v3606_v61  ;;  %2225 = vmatpush.bf16.msra.mxu0 %v3478_v37  ;;  %v3462_v61 = vor.u32 %v4007_v55, %v3459_v58  ;;  %v3626_v29 = vor.u32 %v4050_v1, %v3625_v27  ;;  %v3617_v37 = vld [vmem:[%s6054_s3 + $0x280] sm:$0xf]  ;;  %v3539_v55 = vld [vmem:[%s6054_s3 + $0x1e8] sm:$0xf0]  ;;  %v3499_v27 = vld [vmem:[%s6054_s3 + $0x198] sm:$0xf0] }
 0x10b   :  { %v1419_v39 = vadd.f32 %v1418_v31, %v1406_v30  ;;  %v3435_v30 = vld [vmem:[%s6054_s3 + $0x118] sm:$0xf0]  ;;  %v4055_v31 = vld [vmem:[%s6054_s3 + $0x2c4] sm:$0xf]  ;;  %v3542_v58 = vor.u32 %v4027_v54, %v3539_v55  ;;  %v233_v1 = vperm.slane %v5374_v53, 5 }
 0x10c   :  { %v3438_v34 = vor.u32 %v4001_v28, %v3435_v30  ;;  %v3654_v36 = vor.u32 %v4055_v31, %v3651_v32  ;;  %v4015_v30 = vld [vmem:[%s6054_s3 + $0x184] sm:$0xf]  ;;  %v3491_v31 = vld [vmem:[%s6054_s3 + $0x188] sm:$0xf0] }
 0x10d   :  { %4095 = vtanh.f32 %v1419_v39  ;;  %v3999_v39 = vld [vmem:[%s6054_s3 + $0x104] sm:$0xf] }
 0x10e   :  { %2252 = vmatpush.bf16.msra.mxu2 %v3598_v14  ;;  %2226 = vmatpush.bf16.msra.mxu0 %v3470_v49  ;;  %v4054_v14 = vld [vmem:[%s6054_s3 + $0x2b4] sm:$0xf0]  ;;  %v3430_v47 = vor.u32 %v3999_v39, %v3427_v17  ;;  %v4053_v49 = vld [vmem:[%s6054_s3 + $0x2b4] sm:$0xf] }
 0x10f   :  { %v3642_v9 = vor.u32 %v4054_v14, %v3641_v5 }
 0x110   :  { %v1407_v51 = vpop.f32.mrf.mxu2 }
 0x111   :  { %v1420_v56 = vpop.f32.mrf.mxu3  ;;  %2189 = vmatpush.bf16.msrb.mxu1 %v3642_v9 }
 0x112   :  { %2253 = vmatpush.bf16.msra.mxu2 %v3590_v26  ;;  %2227 = vmatpush.bf16.msra.mxu0 %v3462_v61  ;;  %v3662_v26 = vor.u32 %v4057_v24, %v3659_v25  ;;  %v4051_v56 = vld [vmem:[%s6054_s3 + $0x2a4] sm:$0xf]  ;;  %v3507_v24 = vld [vmem:[%s6054_s3 + $0x1a8] sm:$0xf0] }
 0x113   :  { %v4096_v2 = vpop.eup %4095 }
 0x114   :  { %v5812_v4 = vpack.c.bf16 %v4096_v2, %v4096_v2  ;;  %v4025_v2 = vld [vmem:[%s6054_s3 + $0x1d4] sm:$0xf] }
 0x115   :  { %2190 = vmatpush.bf16.msrb.mxu1 %v3634_v21  ;;  %v3518_v21 = vor.u32 %v4021_v16, %v3515_v18  ;;  %v4072_v16 = vld [vmem:[%s6058_s5 + $0x48] sm:$0xff] }
 0x116   :  { %2254 = vmatpush.bf16.msra.mxu2 %v3582_v38  ;;  %2167 = vmatmul.bf16.vlgmr.msra.gmra.mxu3 %v5812_v4  ;;  %v4048_v38 = vld [vmem:[%s6054_s3 + $0x284] sm:$0xf0] }
 0x117   :  { %2263 = vmatpush.bf16.msra.mxu3 %v3678_v3  ;;  %2228 = vmatpush.bf16.msra.mxu0 %v3454_v11  ;;  %v3618_v42 = vor.u32 %v4048_v38, %v3617_v37  ;;  %v4049_v3 = vld [vmem:[%s6054_s3 + $0x294] sm:$0xf] }
 0x118   :  { %v3630_v9 = vor.u32 %v4049_v3, %v3627_v6  ;;  %v4078_v3 = vld [vmem:[%s6058_s5 + $0x78] sm:$0xff]  ;;  %v4064_v6 = vld [vmem:[%s6058_s5 + $0x8] sm:$0xff] }
 0x119   :  { %2191 = vmatpush.bf16.msrb.mxu1 %v3626_v29 }
 0x11a   :  { %2255 = vmatpush.bf16.msra.mxu2 %v3574_v50  ;;  %v3643_v50 = vld [vmem:[%s6054_s3 + $0x2b8] sm:$0xf0] }
 0x11b   :  { %2264 = vmatpush.bf16.msra.mxu3 %v3670_v15  ;;  %2229 = vmatpush.bf16.msra.mxu0 %v3446_v22  ;;  %v3646_v51 = vor.u32 %v4053_v49, %v3643_v50  ;;  %v4019_v22 = vld [vmem:[%s6054_s3 + $0x1a4] sm:$0xf] }
 0x11c   :  { %v3510_v25 = vor.u32 %v4019_v22, %v3507_v24 }
 0x11d   :  { %2192 = vmatpush.bf16.msrb.mxu1 %v3618_v42 }
 0x11e   :  { %2256 = vmatpush.bf16.msra.mxu2 %v3566_v62  ;;  %v3638_v62 = vor.u32 %v4051_v56, %v3635_v60 }
 0x11f   :  { %2265 = vmatpush.bf16.msra.mxu3 %v3662_v26  ;;  %2230 = vmatpush.bf16.msra.mxu0 %v3438_v34  ;;  %v4017_v26 = vld [vmem:[%s6054_s3 + $0x194] sm:$0xf]  ;;  %v3494_v34 = vor.u32 %v4015_v30, %v3491_v31 }
 0x120   :  { %v1431_v41 = vpop.f32.mrf.mxu0  ;;  %v3502_v28 = vor.u32 %v4017_v26, %v3499_v27 }
 0x121   :  { %v1432_v45 = vadd.f32 %v1431_v41, %v232_v35  ;;  %v1444_v46 = vpop.f32.mrf.mxu1  ;;  %2237 = vmatpush.bf16.msra.mxu1 %v3550_v48 }
 0x122   :  { %2257 = vmatpush.bf16.msra.mxu2 %v3558_v8  ;;  %v3526_v8 = vor.u32 %v4023_v10, %v3523_v7  ;;  %v4063_v7 = vld [vmem:[%s6058_s5] sm:$0xff] }
 0x123   :  { %2266 = vmatpush.bf16.msra.mxu3 %v3654_v36  ;;  %v1445_v52 = vadd.f32 %v1444_v46, %v1432_v45  ;;  %2231 = vmatpush.bf16.msra.mxu0 %v3430_v47  ;;  %v5966_v46 = vld [vmem:[%s6056_s4] sm:$0x3] }
 0x124   :  { %v1636_v47 = vperm.slane %v5966_v46, 0  ;;  %v1637_v27 = vperm.slane %v5966_v46, 1  ;;  %v4081_v46 = vld [vmem:[%s6060_s7 + $0x10] sm:$0xff] }
 0x125   :  { %2238 = vmatpush.bf16.msra.mxu1 %v3542_v58 }
 0x126   :  { %2219 = vmatmul.bf16.vlgmr.msrb.gmra.mxu3 %v5554_v33  ;;  %v3531_v33 = vld [vmem:[%s6054_s3 + $0x1d8] sm:$0xf0] }
 0x127   :  { %2267 = vmatpush.bf16.msra.mxu3 %v3646_v51  ;;  %v3534_v14 = vor.u32 %v4025_v2, %v3531_v33  ;;  %v4066_v2 = vld [vmem:[%s6058_s5 + $0x18] sm:$0xff]  ;;  %v4065_v33 = vld [vmem:[%s6058_s5 + $0x10] sm:$0xff] }
 0x128   :  { %v1457_v57 = vpop.f32.mrf.mxu2  ;;  %v1433_v0 = vpop.f32.mrf.mxu0 }
 0x129   :  { %v1458_v23 = vadd.f32 %v1457_v57, %v1445_v52  ;;  %v1470_v61 = vpop.f32.mrf.mxu3  ;;  %v1446_v5 = vpop.f32.mrf.mxu1  ;;  %2239 = vmatpush.bf16.msra.mxu1 %v3534_v14 }
 0x12b   :  { %v1471_v63 = vadd.f32 %v1470_v61, %v1458_v23  ;;  %2268 = vmatpush.bf16.msra.mxu3 %v3638_v62  ;;  %v4070_v23 = vld [vmem:[%s6058_s5 + $0x38] sm:$0xff]  ;;  %v4069_v61 = vld [vmem:[%s6058_s5 + $0x30] sm:$0xff] }
 0x12d   :  { %4097 = vtanh.f32 %v1471_v63  ;;  %2240 = vmatpush.bf16.msra.mxu1 %v3526_v8  ;;  %v4067_v63 = vld [vmem:[%s6058_s5 + $0x20] sm:$0xff] }
 0x12e   :  { %v4075_v8 = vld [vmem:[%s6058_s5 + $0x60] sm:$0xff] }
 0x12f   :  { %2269 = vmatpush.bf16.msra.mxu3 %v3630_v9  ;;  %v4077_v9 = vld [vmem:[%s6058_s5 + $0x70] sm:$0xff] }
 0x130   :  { %v1459_v11 = vpop.f32.mrf.mxu2 }
 0x131   :  { %v1472_v12 = vpop.f32.mrf.mxu3  ;;  %2241 = vmatpush.bf16.msra.mxu1 %v3518_v21 }
 0x132   :  { %v4074_v12 = vld [vmem:[%s6058_s5 + $0x58] sm:$0xff] }
 0x133   :  { %v4098_v15 = vpop.eup %4097  ;;  %2270 = vmatpush.bf16.msra.mxu3 %v3622_v13 }
 0x134   :  { %v1536_v20 = vpack.c.bf16 %v4098_v15, %v4098_v15  ;;  %v4073_v15 = vld [vmem:[%s6058_s5 + $0x50] sm:$0xff] }
 0x135   :  { %2242 = vmatpush.bf16.msra.mxu1 %v3510_v25 }
 0x136   :  { %2180 = vmatmul.bf16.vlgmr.msrb.gmra.mxu0 %v1536_v20  ;;  %2258 = vmatmul.bf16.vlgmr.msra.gmra.mxu2 %v1536_v20  ;;  %v4071_v20 = vld [vmem:[%s6058_s5 + $0x40] sm:$0xff] }
 0x137   :  { %2412 = vmatpush.bf16.msrb.mxu0 %v4070_v23 }
 0x139   :  { %2243 = vmatpush.bf16.msra.mxu1 %v3502_v28 }
 0x13b   :  { %2413 = vmatpush.bf16.msrb.mxu0 %v4069_v61 }
 0x13d   :  { %2244 = vmatpush.bf16.msra.mxu1 %v3494_v34 }
 0x140   :  { %v1483_v29 = vpop.f32.mrf.mxu0 }
 0x141   :  { %v1484_v32 = vadd.f32 %v1483_v29, %v233_v1  ;;  %v1496_v35 = vpop.f32.mrf.mxu1 }
 0x143   :  { %v1497_v36 = vadd.f32 %v1496_v35, %v1484_v32 }
 0x146   :  { %2232 = vmatmul.bf16.vlgmr.msra.gmra.mxu0 %v5663_v40 }
 0x148   :  { %v1509_v37 = vpop.f32.mrf.mxu2  ;;  %v1485_v39 = vpop.f32.mrf.mxu0 }
 0x149   :  { %v1510_v53 = vadd.f32 %v1509_v37, %v1497_v36  ;;  %v1522_v38 = vpop.f32.mrf.mxu3  ;;  %v1498_v41 = vpop.f32.mrf.mxu1 }
 0x14b   :  { %v1523_v42 = vadd.f32 %v1522_v38, %v1510_v53 }
 0x14d   :  { %4099 = vtanh.f32 %v1523_v42  ;;  %v4086_v42 = vld [vmem:[%s6060_s7 + $0x38] sm:$0xff] }
 0x14e   :  { %2508 = vmatpush.bf16.msrb.mxu2 %v4086_v42 }
 0x150   :  { %v1511_v17 = vpop.f32.mrf.mxu2 }
 0x151   :  { %v1524_v43 = vpop.f32.mrf.mxu3  ;;  %v4085_v17 = vld [vmem:[%s6060_s7 + $0x30] sm:$0xff] }
 0x152   :  { %2509 = vmatpush.bf16.msrb.mxu2 %v4085_v17  ;;  %v4084_v43 = vld [vmem:[%s6060_s7 + $0x28] sm:$0xff] }
 0x153   :  { %v4100_v44 = vpop.eup %4099 }
 0x154   :  { %v1537_v45 = vpack.c.bf16 %v4100_v44, %v4100_v44  ;;  %v4083_v44 = vld [vmem:[%s6060_s7 + $0x20] sm:$0xff] }
 0x156   :  { %2193 = vmatmul.bf16.vlgmr.msrb.gmra.mxu1 %v1537_v45  ;;  %2271 = vmatmul.bf16.vlgmr.msra.gmra.mxu3 %v1537_v45  ;;  %v4082_v45 = vld [vmem:[%s6060_s7 + $0x18] sm:$0xff] }
 0x157   :  { %2425 = vmatpush.bf16.msrb.mxu1 %v4078_v3  ;;  %2510 = vmatpush.bf16.msrb.mxu2 %v4084_v43 }
 0x15b   :  { %2426 = vmatpush.bf16.msrb.mxu1 %v4077_v9  ;;  %2511 = vmatpush.bf16.msrb.mxu2 %v4083_v44 }
 0x15f   :  { %2427 = vmatpush.bf16.msrb.mxu1 %v4076_v19  ;;  %2512 = vmatpush.bf16.msrb.mxu2 %v4082_v45 }
 0x160   :  { %v2129_v40 = vpop.f32.mrf.mxu0 }
 0x161   :  { %v2130_v48 = vadd.f32 %v2129_v40, %v1636_v47  ;;  %v2142_v49 = vpop.f32.mrf.mxu1  ;;  %v4080_v47 = vld [vmem:[%s6060_s7 + $0x8] sm:$0xff]  ;;  %v4079_v40 = vld [vmem:[%s6060_s7] sm:$0xff] }
 0x163   :  { %v2143_v50 = vadd.f32 %v2142_v49, %v2130_v48  ;;  %2428 = vmatpush.bf16.msrb.mxu1 %v4075_v8  ;;  %2513 = vmatpush.bf16.msrb.mxu2 %v4081_v46 }
 0x166   :  { %2245 = vmatmul.bf16.vlgmr.msra.gmra.mxu1 %v5812_v4  ;;  %v4068_v4 = vld [vmem:[%s6058_s5 + $0x28] sm:$0xff] }
 0x167   :  { %2414 = vmatpush.bf16.msrb.mxu0 %v4068_v4  ;;  %2429 = vmatpush.bf16.msrb.mxu1 %v4074_v12 }
 0x168   :  { %v2131_v51 = vpop.f32.mrf.mxu0  ;;  %2514 = vmatpush.bf16.msrb.mxu2 %v4080_v47 }
 0x169   :  { %v2144_v52 = vpop.f32.mrf.mxu1 }
 0x16b   :  { %2415 = vmatpush.bf16.msrb.mxu0 %v4067_v63  ;;  %2430 = vmatpush.bf16.msrb.mxu1 %v4073_v15 }
 0x16c   :  { %2515 = vmatpush.bf16.msrb.mxu2 %v4079_v40 }
 0x16f   :  { %2416 = vmatpush.bf16.msrb.mxu0 %v4066_v2  ;;  %2431 = vmatpush.bf16.msrb.mxu1 %v4072_v16 }
 0x173   :  { %2417 = vmatpush.bf16.msrb.mxu0 %v4065_v33  ;;  %2432 = vmatpush.bf16.msrb.mxu1 %v4071_v20 }
 0x177   :  { %2418 = vmatpush.bf16.msrb.mxu0 %v4064_v6 }
 0x17a   :  { %v2155_v54 = vpop.f32.mrf.mxu2 }
 0x17b   :  { %v2156_v55 = vadd.f32 %v2155_v54, %v2143_v50  ;;  %2419 = vmatpush.bf16.msrb.mxu0 %v4063_v7  ;;  %v4087_v50 = vld [vmem:[%s6057_s6] ss:$0 sm:$0xff] }
 0x182   :  { %v2157_v56 = vpop.f32.mrf.mxu2 }
 0x18a   :  { %v2207_v57 = vpop.f32.mrf.mxu2 }
 0x18b   :  { %v2208_v30 = vadd.f32 %v2207_v57, %v1637_v27 }
 0x192   :  { %v2209_v58 = vpop.f32.mrf.mxu2 }
 0x193   :  { %v4088_v58 = vld [vmem:[%s6059_s8] ss:$0 sm:$0xff] }
 0x199   :  { %v2168_v60 = vpop.f32.mrf.mxu3 }
 0x19a   :  { %v2169_v21 = vadd.f32 %v2168_v60, %v2156_v55 }
 0x1a1   :  { %v2170_v62 = vpop.f32.mrf.mxu3 }
 0x1a9   :  { %v2220_v0 = vpop.f32.mrf.mxu3 }
 0x1aa   :  { %v2221_v31 = vadd.f32 %v2220_v0, %v2208_v30 }
 0x1b1   :  { %v2222_v14 = vpop.f32.mrf.mxu3 }
 0x1b3   :  { %v2181_v5 = vpop.f32.mrf.mxu0 }
 0x1b4   :  { %v2182_v22 = vadd.f32 %v2181_v5, %v2169_v21 }
 0x1b9   :  { %v2259_v10 = vpop.f32.mrf.mxu2 }
 0x1bb   :  { %v2183_v11 = vpop.f32.mrf.mxu0 }
 0x1c1   :  { %v2261_v59 = vpop.f32.mrf.mxu2 }
 0x1c3   :  { %v2233_v13 = vpop.f32.mrf.mxu0 }
 0x1c4   :  { %v2234_v35 = vadd.f32 %v2233_v13, %v2221_v31 }
 0x1cb   :  { %v2235_v18 = vpop.f32.mrf.mxu0 }
 0x1d3   :  { %v2194_v24 = vpop.f32.mrf.mxu1 }
 0x1d4   :  { %v2195_v25 = vadd.f32 %v2194_v24, %v2182_v22 }
 0x1d6   :  { %4101 = vtanh.f32 %v2195_v25 }
 0x1d9   :  { %v2272_v26 = vpop.f32.mrf.mxu3 }
 0x1db   :  { %v2196_v1 = vpop.f32.mrf.mxu1 }
 0x1dc   :  { %v4102_v28 = vpop.eup %4101 }
 0x1dd   :  { %v2278_v29 = vpack.c.bf16 %v4102_v28, %v4102_v28 }
 0x1df   :  { %2420 = vmatmul.bf16.vlgmr.msrb.gmra.mxu0 %v2278_v29 }
 0x1e1   :  { %v2274_v32 = vpop.f32.mrf.mxu3 }
 0x1e3   :  { %v2246_v34 = vpop.f32.mrf.mxu1 }
 0x1e4   :  { %v2247_v36 = vadd.f32 %v2246_v34, %v2234_v35 }
 0x1e6   :  { %v2260_v37 = vadd.f32 %v2259_v10, %v2247_v36 }
 0x1e8   :  { %v2273_v53 = vadd.f32 %v2272_v26, %v2260_v37 }
 0x1ea   :  { %4103 = vtanh.f32 %v2273_v53 }
 0x1eb   :  { %v2248_v38 = vpop.f32.mrf.mxu1 }
 0x1f0   :  { %v4104_v39 = vpop.eup %4103 }
 0x1f1   :  { %v2279_v41 = vpack.c.bf16 %v4104_v39, %v4104_v39 }
 0x1f3   :  { %2433 = vmatmul.bf16.vlgmr.msrb.gmra.mxu1 %v2279_v41 }
 0x25c   :  { %v2421_v48 = vpop.f32.mrf.mxu0 }
 0x25d   :  { %v2422_v51 = vadd.f32 %v4087_v50, %v2421_v48 }
 0x264   :  { %v2423_v49 = vpop.f32.mrf.mxu0 }
 0x270   :  { %v2434_v52 = vpop.f32.mrf.mxu1 }
 0x271   :  { %v2435_v54 = vadd.f32 %v2434_v52, %v2422_v51 }
 0x273   :  { %4105 = vtanh.f32 %v2435_v54 }
 0x278   :  { %v2436_v55 = vpop.f32.mrf.mxu1 }
 0x279   :  { %v4106_v56 = vpop.eup %4105 }
 0x27a   :  { %v2439_v57 = vpack.c.bf16 %v4106_v56, %v4106_v56 }
 0x27c   :  { %2516 = vmatmul.bf16.vlgmr.msrb.gmra.mxu2 %v2439_v57 }
 0x2ff   :  { %v2517_v60 = vpop.f32.mrf.mxu2 }
 0x300   :  { %v2518_v23 = vadd.f32 %v4088_v58, %v2517_v60 }
 0x302   :  { %4107 = vtanh.f32 %v2518_v23 }
 0x307   :  { %v2519_v61 = vpop.f32.mrf.mxu2 }
 0x308   :  { %v4108_v62 = vpop.eup %4107 }
 0x309   :  { %2522 = vst [vmem:[%s6061_s9] sm:$0xff] %v4108_v62 }

</bundles_post_ra>
